<compile_context>
chip_gen: v7x
topology: tpu7x:2x2x1
jax: 0.10.0
libtpu: 0.0.40
codegen_flags: <defaults>
</compile_context>

<pallas_src>
import functools

import numpy as np
import jax
import jax.numpy as jnp
from jax.experimental import pallas as pl
from jax.experimental.pallas import tpu as pltpu

# Small, lane/sublane-friendly sizes (PyTorch module uses embed=256, hidden=512).
EMBED = 128
HIDDEN = 128
VOCAB = 256
BATCH = 8                 # 8 sublanes
T_CAP = 8                 # caption length (padded)
T_SEQ = T_CAP + 1         # +1 for the image-feature step prepended to the embeddings


# --------------------------- Fused decoder kernel ----------------------------
def fused_decoder_kernel(x_ref, w_ih_ref, w_hh_ref, bias_ref, w_lin_ref, b_lin_ref,
                         logits_ref, gx_scr, h_all_scr, *, batch):
    """x:(T*B,E) bf16 time-major; weights pre-transposed bf16; biases f32.

    logits:(T*B,V) f32 for all rows (packed selection happens outside).
    """
    TB = x_ref.shape[0]
    H = w_hh_ref.shape[0]
    Bn = batch
    Tn = TB // Bn

    # ---- Stage 1: input projection for ALL (T+1)*B rows in one MXU matmul,
    # combined LSTM bias (b_ih + b_hh) folded in.  Lives in VMEM scratch.
    gx_scr[...] = (jnp.dot(x_ref[...], w_ih_ref[...],
                           preferred_element_type=jnp.float32)
                   + bias_ref[...])

    # ---- Stage 2: LSTM recurrence.  Fully unrolled static loop; the serial
    # path only does h @ W_hh^T + elementwise gates (x-projection already done).
    h = jnp.zeros((Bn, H), jnp.float32)
    c = jnp.zeros((Bn, H), jnp.float32)
    for t in range(Tn):                                   # Tn static -> unrolled
        gates = gx_scr[t * Bn:(t + 1) * Bn, :] + jnp.dot(
            h.astype(jnp.bfloat16), w_hh_ref[...],
            preferred_element_type=jnp.float32)           # (B, 4H) f32
        i_g = jax.nn.sigmoid(gates[:, 0 * H:1 * H])       # PyTorch gate order i,f,g,o
        f_g = jax.nn.sigmoid(gates[:, 1 * H:2 * H])
        g_g = jnp.tanh(gates[:, 2 * H:3 * H])
        o_g = jax.nn.sigmoid(gates[:, 3 * H:4 * H])
        c = f_g * c + i_g * g_g
        h = o_g * jnp.tanh(c)
        h_all_scr[t * Bn:(t + 1) * Bn, :] = h             # static, sublane-aligned store

    # ---- Stage 3: output Linear on all rows, one lane-dense (TB,H)@(H,V) matmul.
    logits_ref[...] = (jnp.dot(h_all_scr[...].astype(jnp.bfloat16), w_lin_ref[...],
                               preferred_element_type=jnp.float32)
                       + b_lin_ref[...])


def run_decoder_fused(x_flat, w_ih_t, w_hh_t, lstm_bias, w_lin_t, b_lin, *, batch):
    TB, _ = x_flat.shape
    H = w_hh_t.shape[0]
    V = w_lin_t.shape[1]
    vmem = lambda: pl.BlockSpec(memory_space=pltpu.MemorySpace.VMEM)
    return pl.pallas_call(
        functools.partial(fused_decoder_kernel, batch=batch),
        out_shape=jax.ShapeDtypeStruct((TB, V), jnp.float32),
        in_specs=[vmem() for _ in range(6)],
        out_specs=vmem(),
        scratch_shapes=[
            pltpu.VMEM((TB, 4 * H), jnp.float32),   # gx = x @ W_ih^T + bias
            pltpu.VMEM((TB, H), jnp.float32),       # h history for the output Linear
        ],
    )(x_flat, w_ih_t, w_hh_t, lstm_bias, w_lin_t, b_lin)


# ----------------------------- Forward wrapper --------------------------------
def packed_flat_indices(lengths, batch):
    """Row indices (into time-major (t*B + b) layout) in pack_padded_sequence
    order (batch_first=True, enforce_sorted=True)."""
    lengths = [int(l) for l in lengths]
    assert len(lengths) == batch
    assert all(lengths[i] >= lengths[i + 1] for i in range(len(lengths) - 1)), \
        "lengths must be sorted descending (enforce_sorted=True)"
    idx = [t * batch + b
           for t in range(max(lengths))
           for b in range(batch) if lengths[b] > t]
    return np.asarray(idx, dtype=np.int32)


def decoder_forward(params, features, captions, lengths):
    # Build the LSTM input directly in time-major order: (T+1, B, E).
    emb_t = params["embed"][captions.T]                              # (T, B, E) f32
    inputs_tbe = jnp.concatenate([features[None], emb_t], axis=0)    # (T+1, B, E)
    Tn, Bn, E = inputs_tbe.shape
    x_flat = inputs_tbe.reshape(Tn * Bn, E).astype(jnp.bfloat16)     # (TB, E) bf16

    logits_all = run_decoder_fused(
        x_flat, params["w_ih_t"], params["w_hh_t"], params["lstm_bias"],
        params["w_lin_t"], params["b_lin"], batch=Bn)                # (TB, V) f32

    # pack_padded_sequence: select valid (t, b) rows in packed order.
    flat_idx = packed_flat_indices(lengths, Bn)
    return logits_all[jnp.asarray(flat_idx)]                         # (N, V)


# ----------------------------- Pure-JAX reference ----------------------------
# Same math (bf16 matmul operands, f32 accumulation) so the tolerance check is
# a genuine test of the Pallas kernel, not of bf16-vs-f32 drift.
def decoder_forward_ref(params, features, captions, lengths):
    emb_t = params["embed"][captions.T]
    inputs = jnp.concatenate([features[None], emb_t], axis=0)        # (T+1, B, E)
    Tn, Bn, E = inputs.shape
    H = HIDDEN
    x = inputs.astype(jnp.bfloat16)
    gx = (jnp.dot(x.reshape(Tn * Bn, E), params["w_ih_t"],
                  preferred_element_type=jnp.float32).reshape(Tn, Bn, 4 * H)
          + params["lstm_bias"][0])
    h = jnp.zeros((Bn, H), jnp.float32)
    c = jnp.zeros((Bn, H), jnp.float32)
    hs = []
    for t in range(Tn):
        gates = gx[t] + jnp.dot(h.astype(jnp.bfloat16), params["w_hh_t"],
                                preferred_element_type=jnp.float32)
        i_g = jax.nn.sigmoid(gates[:, :H])
        f_g = jax.nn.sigmoid(gates[:, H:2 * H])
        g_g = jnp.tanh(gates[:, 2 * H:3 * H])
        o_g = jax.nn.sigmoid(gates[:, 3 * H:])
        c = f_g * c + i_g * g_g
        h = o_g * jnp.tanh(c)
        hs.append(h)
    h_all = jnp.stack(hs, axis=0).reshape(Tn * Bn, H)
    logits_all = (jnp.dot(h_all.astype(jnp.bfloat16), params["w_lin_t"],
                          preferred_element_type=jnp.float32) + params["b_lin"][0])
    flat_idx = packed_flat_indices(lengths, Bn)
    return logits_all[jnp.asarray(flat_idx)]


# ----------------------------- Setup / main -----------------------------------
def init_params(key):
    ks = jax.random.split(key, 6)
    scale = 1.0 / np.sqrt(HIDDEN)
    uni = lambda k, shape: jax.random.uniform(k, shape, jnp.float32, -scale, scale)
    return {
        "embed": jax.random.normal(ks[0], (VOCAB, EMBED), jnp.float32) * 0.1,
        # stored pre-transposed + bf16 for the kernel: x @ W_ih^T, h @ W_hh^T, h @ W_lin^T
        "w_ih_t": uni(ks[1], (EMBED, 4 * HIDDEN)).astype(jnp.bfloat16),
        "w_hh_t": uni(ks[2], (HIDDEN, 4 * HIDDEN)).astype(jnp.bfloat16),
        "lstm_bias": uni(ks[3], (1, 4 * HIDDEN)),        # b_ih + b_hh combined, f32
        "w_lin_t": uni(ks[4], (HIDDEN, VOCAB)).astype(jnp.bfloat16),
        "b_lin": uni(ks[5], (1, VOCAB)),                 # f32
    }


if __name__ == "__main__":
    key = jax.random.PRNGKey(0)
    kp, kf, kc = jax.random.split(key, 3)

    params = init_params(kp)
    features = jax.random.normal(kf, (BATCH, EMBED), jnp.float32)
    captions = jax.random.randint(kc, (BATCH, T_CAP), 0, VOCAB, jnp.int32)
    lengths = [9, 9, 8, 7, 6, 4, 3, 2]   # sorted descending, <= T_CAP + 1

    out = decoder_forward(params, features, captions, lengths)
    out = jax.block_until_ready(out)

    ref = decoder_forward_ref(params, features, captions, lengths)
    assert out.shape == (sum(lengths), VOCAB), out.shape
    np.testing.assert_allclose(np.asarray(out), np.asarray(ref), rtol=5e-3, atol=5e-3)

    print("KERNEL_OK")
</pallas_src>

<mosaic_0001>
module attributes {stable_mosaic.version = 11 : i64} {
  func.func @fused_decoder_kernel(%arg0: memref<72x128xbf16, #tpu.memory_space<vmem>>, %arg1: memref<128x512xbf16, #tpu.memory_space<vmem>>, %arg2: memref<128x512xbf16, #tpu.memory_space<vmem>>, %arg3: memref<1x512xf32, #tpu.memory_space<vmem>>, %arg4: memref<128x256xbf16, #tpu.memory_space<vmem>>, %arg5: memref<1x256xf32, #tpu.memory_space<vmem>>, %arg6: memref<72x256xf32, #tpu.memory_space<vmem>>, %arg7: memref<72x512xf32, #tpu.memory_space<vmem>>, %arg8: memref<72x128xf32, #tpu.memory_space<vmem>>) attributes {dimension_semantics = [], scalar_prefetch = 0 : i64, scratch_operands = 2 : i64, tpu.core_type = #tpu.core_type<tc>} {
    %c0 = arith.constant 0 : index
    %c0_0 = arith.constant 0 : index
    %0 = vector.load %arg0[%c0, %c0_0] : memref<72x128xbf16, #tpu.memory_space<vmem>>, vector<72x128xbf16>
    %c0_1 = arith.constant 0 : index
    %c0_2 = arith.constant 0 : index
    %1 = vector.load %arg1[%c0_1, %c0_2] : memref<128x512xbf16, #tpu.memory_space<vmem>>, vector<128x512xbf16>
    %cst = arith.constant dense<0.000000e+00> : vector<72x512xf32>
    %2 = tpu.matmul %0, %1, %cst {dimension_numbers = #tpu.dot_dimension_numbers<[1], [0], [0], [1], [0, 0, 1, 1], [], []>} : vector<72x128xbf16>, vector<128x512xbf16>, vector<72x512xf32> -> vector<72x512xf32>
    %c0_3 = arith.constant 0 : index
    %c0_4 = arith.constant 0 : index
    %3 = vector.load %arg3[%c0_3, %c0_4] : memref<1x512xf32, #tpu.memory_space<vmem>>, vector<1x512xf32>
    %4 = vector.broadcast %3 : vector<1x512xf32> to vector<72x512xf32>
    %5 = arith.addf %2, %4 : vector<72x512xf32>
    %c0_5 = arith.constant 0 : index
    %c0_6 = arith.constant 0 : index
    %6 = vector.load %arg7[%c0_5, %c0_6] : memref<72x512xf32, #tpu.memory_space<vmem>>, vector<72x512xf32>
    tpu.vector_store %arg7[%c0_5, %c0_6], %5 {strides = array<i32>} : memref<72x512xf32, #tpu.memory_space<vmem>>, vector<72x512xf32>,
    %cst_7 = arith.constant 0.000000e+00 : f32
    %7 = vector.broadcast %cst_7 : f32 to vector<8x128xf32>
    %cst_8 = arith.constant 0.000000e+00 : f32
    %8 = vector.broadcast %cst_8 : f32 to vector<8x128xf32>
    %c0_9 = arith.constant 0 : index
    %c0_10 = arith.constant 0 : index
    %9 = vector.load %arg7[%c0_9, %c0_10] : memref<72x512xf32, #tpu.memory_space<vmem>>, vector<8x512xf32>
    %10 = arith.truncf %7 : vector<8x128xf32> to vector<8x128xbf16>
    %c0_11 = arith.constant 0 : index
    %c0_12 = arith.constant 0 : index
    %11 = vector.load %arg2[%c0_11, %c0_12] : memref<128x512xbf16, #tpu.memory_space<vmem>>, vector<128x512xbf16>
    %cst_13 = arith.constant dense<0.000000e+00> : vector<8x512xf32>
    %12 = tpu.matmul %10, %11, %cst_13 {dimension_numbers = #tpu.dot_dimension_numbers<[1], [0], [0], [1], [0, 0, 1, 1], [], []>} : vector<8x128xbf16>, vector<128x512xbf16>, vector<8x512xf32> -> vector<8x512xf32>
    %13 = arith.addf %9, %12 : vector<8x512xf32>
    %14 = vector.extract_strided_slice %13 {offsets = [0, 0], sizes = [8, 128], strides = [1, 1]} : vector<8x512xf32> to vector<8x128xf32>
    %15 = arith.negf %14 : vector<8x128xf32>
    %16 = math.exp %15 : vector<8x128xf32>
    %cst_14 = arith.constant 1.000000e+00 : f32
    %17 = vector.broadcast %cst_14 : f32 to vector<8x128xf32>
    %18 = arith.addf %17, %16 : vector<8x128xf32>
    %19 = arith.divf %17, %18 : vector<8x128xf32>
    %20 = vector.extract_strided_slice %13 {offsets = [0, 128], sizes = [8, 128], strides = [1, 1]} : vector<8x512xf32> to vector<8x128xf32>
    %21 = arith.negf %20 : vector<8x128xf32>
    %22 = math.exp %21 : vector<8x128xf32>
    %cst_15 = arith.constant 1.000000e+00 : f32
    %23 = vector.broadcast %cst_15 : f32 to vector<8x128xf32>
    %24 = arith.addf %23, %22 : vector<8x128xf32>
    %25 = arith.divf %23, %24 : vector<8x128xf32>
    %26 = vector.extract_strided_slice %13 {offsets = [0, 256], sizes = [8, 128], strides = [1, 1]} : vector<8x512xf32> to vector<8x128xf32>
    %27 = math.tanh %26 : vector<8x128xf32>
    %28 = vector.extract_strided_slice %13 {offsets = [0, 384], sizes = [8, 128], strides = [1, 1]} : vector<8x512xf32> to vector<8x128xf32>
    %29 = arith.negf %28 : vector<8x128xf32>
    %30 = math.exp %29 : vector<8x128xf32>
    %cst_16 = arith.constant 1.000000e+00 : f32
    %31 = vector.broadcast %cst_16 : f32 to vector<8x128xf32>
    %32 = arith.addf %31, %30 : vector<8x128xf32>
    %33 = arith.divf %31, %32 : vector<8x128xf32>
    %34 = arith.mulf %25, %8 : vector<8x128xf32>
    %35 = arith.mulf %19, %27 : vector<8x128xf32>
    %36 = arith.addf %34, %35 : vector<8x128xf32>
    %37 = math.tanh %36 : vector<8x128xf32>
    %38 = arith.mulf %33, %37 : vector<8x128xf32>
    %c0_17 = arith.constant 0 : index
    %c0_18 = arith.constant 0 : index
    %39 = vector.load %arg8[%c0_17, %c0_18] : memref<72x128xf32, #tpu.memory_space<vmem>>, vector<8x128xf32>
    tpu.vector_store %arg8[%c0_17, %c0_18], %38 {strides = array<i32>} : memref<72x128xf32, #tpu.memory_space<vmem>>, vector<8x128xf32>,
    %c8 = arith.constant 8 : index
    %c0_19 = arith.constant 0 : index
    %40 = vector.load %arg7[%c8, %c0_19] : memref<72x512xf32, #tpu.memory_space<vmem>>, vector<8x512xf32>
    %41 = arith.truncf %38 : vector<8x128xf32> to vector<8x128xbf16>
    %c0_20 = arith.constant 0 : index
    %c0_21 = arith.constant 0 : index
    %42 = vector.load %arg2[%c0_20, %c0_21] : memref<128x512xbf16, #tpu.memory_space<vmem>>, vector<128x512xbf16>
    %cst_22 = arith.constant dense<0.000000e+00> : vector<8x512xf32>
    %43 = tpu.matmul %41, %42, %cst_22 {dimension_numbers = #tpu.dot_dimension_numbers<[1], [0], [0], [1], [0, 0, 1, 1], [], []>} : vector<8x128xbf16>, vector<128x512xbf16>, vector<8x512xf32> -> vector<8x512xf32>
    %44 = arith.addf %40, %43 : vector<8x512xf32>
    %45 = vector.extract_strided_slice %44 {offsets = [0, 0], sizes = [8, 128], strides = [1, 1]} : vector<8x512xf32> to vector<8x128xf32>
    %46 = arith.negf %45 : vector<8x128xf32>
    %47 = math.exp %46 : vector<8x128xf32>
    %cst_23 = arith.constant 1.000000e+00 : f32
    %48 = vector.broadcast %cst_23 : f32 to vector<8x128xf32>
    %49 = arith.addf %48, %47 : vector<8x128xf32>
    %50 = arith.divf %48, %49 : vector<8x128xf32>
    %51 = vector.extract_strided_slice %44 {offsets = [0, 128], sizes = [8, 128], strides = [1, 1]} : vector<8x512xf32> to vector<8x128xf32>
    %52 = arith.negf %51 : vector<8x128xf32>
    %53 = math.exp %52 : vector<8x128xf32>
    %cst_24 = arith.constant 1.000000e+00 : f32
    %54 = vector.broadcast %cst_24 : f32 to vector<8x128xf32>
    %55 = arith.addf %54, %53 : vector<8x128xf32>
    %56 = arith.divf %54, %55 : vector<8x128xf32>
    %57 = vector.extract_strided_slice %44 {offsets = [0, 256], sizes = [8, 128], strides = [1, 1]} : vector<8x512xf32> to vector<8x128xf32>
    %58 = math.tanh %57 : vector<8x128xf32>
    %59 = vector.extract_strided_slice %44 {offsets = [0, 384], sizes = [8, 128], strides = [1, 1]} : vector<8x512xf32> to vector<8x128xf32>
    %60 = arith.negf %59 : vector<8x128xf32>
    %61 = math.exp %60 : vector<8x128xf32>
    %cst_25 = arith.constant 1.000000e+00 : f32
    %62 = vector.broadcast %cst_25 : f32 to vector<8x128xf32>
    %63 = arith.addf %62, %61 : vector<8x128xf32>
    %64 = arith.divf %62, %63 : vector<8x128xf32>
    %65 = arith.mulf %56, %36 : vector<8x128xf32>
    %66 = arith.mulf %50, %58 : vector<8x128xf32>
    %67 = arith.addf %65, %66 : vector<8x128xf32>
    %68 = math.tanh %67 : vector<8x128xf32>
    %69 = arith.mulf %64, %68 : vector<8x128xf32>
    %c8_26 = arith.constant 8 : index
    %c0_27 = arith.constant 0 : index
    %70 = vector.load %arg8[%c8_26, %c0_27] : memref<72x128xf32, #tpu.memory_space<vmem>>, vector<8x128xf32>
    tpu.vector_store %arg8[%c8_26, %c0_27], %69 {strides = array<i32>} : memref<72x128xf32, #tpu.memory_space<vmem>>, vector<8x128xf32>,
    %c16 = arith.constant 16 : index
    %c0_28 = arith.constant 0 : index
    %71 = vector.load %arg7[%c16, %c0_28] : memref<72x512xf32, #tpu.memory_space<vmem>>, vector<8x512xf32>
    %72 = arith.truncf %69 : vector<8x128xf32> to vector<8x128xbf16>
    %c0_29 = arith.constant 0 : index
    %c0_30 = arith.constant 0 : index
    %73 = vector.load %arg2[%c0_29, %c0_30] : memref<128x512xbf16, #tpu.memory_space<vmem>>, vector<128x512xbf16>
    %cst_31 = arith.constant dense<0.000000e+00> : vector<8x512xf32>
    %74 = tpu.matmul %72, %73, %cst_31 {dimension_numbers = #tpu.dot_dimension_numbers<[1], [0], [0], [1], [0, 0, 1, 1], [], []>} : vector<8x128xbf16>, vector<128x512xbf16>, vector<8x512xf32> -> vector<8x512xf32>
    %75 = arith.addf %71, %74 : vector<8x512xf32>
    %76 = vector.extract_strided_slice %75 {offsets = [0, 0], sizes = [8, 128], strides = [1, 1]} : vector<8x512xf32> to vector<8x128xf32>
    %77 = arith.negf %76 : vector<8x128xf32>
    %78 = math.exp %77 : vector<8x128xf32>
    %cst_32 = arith.constant 1.000000e+00 : f32
    %79 = vector.broadcast %cst_32 : f32 to vector<8x128xf32>
    %80 = arith.addf %79, %78 : vector<8x128xf32>
    %81 = arith.divf %79, %80 : vector<8x128xf32>
    %82 = vector.extract_strided_slice %75 {offsets = [0, 128], sizes = [8, 128], strides = [1, 1]} : vector<8x512xf32> to vector<8x128xf32>
    %83 = arith.negf %82 : vector<8x128xf32>
    %84 = math.exp %83 : vector<8x128xf32>
    %cst_33 = arith.constant 1.000000e+00 : f32
    %85 = vector.broadcast %cst_33 : f32 to vector<8x128xf32>
    %86 = arith.addf %85, %84 : vector<8x128xf32>
    %87 = arith.divf %85, %86 : vector<8x128xf32>
    %88 = vector.extract_strided_slice %75 {offsets = [0, 256], sizes = [8, 128], strides = [1, 1]} : vector<8x512xf32> to vector<8x128xf32>
    %89 = math.tanh %88 : vector<8x128xf32>
    %90 = vector.extract_strided_slice %75 {offsets = [0, 384], sizes = [8, 128], strides = [1, 1]} : vector<8x512xf32> to vector<8x128xf32>
    %91 = arith.negf %90 : vector<8x128xf32>
    %92 = math.exp %91 : vector<8x128xf32>
    %cst_34 = arith.constant 1.000000e+00 : f32
    %93 = vector.broadcast %cst_34 : f32 to vector<8x128xf32>
    %94 = arith.addf %93, %92 : vector<8x128xf32>
    %95 = arith.divf %93, %94 : vector<8x128xf32>
    %96 = arith.mulf %87, %67 : vector<8x128xf32>
    %97 = arith.mulf %81, %89 : vector<8x128xf32>
    %98 = arith.addf %96, %97 : vector<8x128xf32>
    %99 = math.tanh %98 : vector<8x128xf32>
    %100 = arith.mulf %95, %99 : vector<8x128xf32>
    %c16_35 = arith.constant 16 : index
    %c0_36 = arith.constant 0 : index
    %101 = vector.load %arg8[%c16_35, %c0_36] : memref<72x128xf32, #tpu.memory_space<vmem>>, vector<8x128xf32>
    tpu.vector_store %arg8[%c16_35, %c0_36], %100 {strides = array<i32>} : memref<72x128xf32, #tpu.memory_space<vmem>>, vector<8x128xf32>,
    %c24 = arith.constant 24 : index
    %c0_37 = arith.constant 0 : index
    %102 = vector.load %arg7[%c24, %c0_37] : memref<72x512xf32, #tpu.memory_space<vmem>>, vector<8x512xf32>
    %103 = arith.truncf %100 : vector<8x128xf32> to vector<8x128xbf16>
    %c0_38 = arith.constant 0 : index
    %c0_39 = arith.constant 0 : index
    %104 = vector.load %arg2[%c0_38, %c0_39] : memref<128x512xbf16, #tpu.memory_space<vmem>>, vector<128x512xbf16>
    %cst_40 = arith.constant dense<0.000000e+00> : vector<8x512xf32>
    %105 = tpu.matmul %103, %104, %cst_40 {dimension_numbers = #tpu.dot_dimension_numbers<[1], [0], [0], [1], [0, 0, 1, 1], [], []>} : vector<8x128xbf16>, vector<128x512xbf16>, vector<8x512xf32> -> vector<8x512xf32>
    %106 = arith.addf %102, %105 : vector<8x512xf32>
    %107 = vector.extract_strided_slice %106 {offsets = [0, 0], sizes = [8, 128], strides = [1, 1]} : vector<8x512xf32> to vector<8x128xf32>
    %108 = arith.negf %107 : vector<8x128xf32>
    %109 = math.exp %108 : vector<8x128xf32>
    %cst_41 = arith.constant 1.000000e+00 : f32
    %110 = vector.broadcast %cst_41 : f32 to vector<8x128xf32>
    %111 = arith.addf %110, %109 : vector<8x128xf32>
    %112 = arith.divf %110, %111 : vector<8x128xf32>
    %113 = vector.extract_strided_slice %106 {offsets = [0, 128], sizes = [8, 128], strides = [1, 1]} : vector<8x512xf32> to vector<8x128xf32>
    %114 = arith.negf %113 : vector<8x128xf32>
    %115 = math.exp %114 : vector<8x128xf32>
    %cst_42 = arith.constant 1.000000e+00 : f32
    %116 = vector.broadcast %cst_42 : f32 to vector<8x128xf32>
    %117 = arith.addf %116, %115 : vector<8x128xf32>
    %118 = arith.divf %116, %117 : vector<8x128xf32>
    %119 = vector.extract_strided_slice %106 {offsets = [0, 256], sizes = [8, 128], strides = [1, 1]} : vector<8x512xf32> to vector<8x128xf32>
    %120 = math.tanh %119 : vector<8x128xf32>
    %121 = vector.extract_strided_slice %106 {offsets = [0, 384], sizes = [8, 128], strides = [1, 1]} : vector<8x512xf32> to vector<8x128xf32>
    %122 = arith.negf %121 : vector<8x128xf32>
    %123 = math.exp %122 : vector<8x128xf32>
    %cst_43 = arith.constant 1.000000e+00 : f32
    %124 = vector.broadcast %cst_43 : f32 to vector<8x128xf32>
    %125 = arith.addf %124, %123 : vector<8x128xf32>
    %126 = arith.divf %124, %125 : vector<8x128xf32>
    %127 = arith.mulf %118, %98 : vector<8x128xf32>
    %128 = arith.mulf %112, %120 : vector<8x128xf32>
    %129 = arith.addf %127, %128 : vector<8x128xf32>
    %130 = math.tanh %129 : vector<8x128xf32>
    %131 = arith.mulf %126, %130 : vector<8x128xf32>
    %c24_44 = arith.constant 24 : index
    %c0_45 = arith.constant 0 : index
    %132 = vector.load %arg8[%c24_44, %c0_45] : memref<72x128xf32, #tpu.memory_space<vmem>>, vector<8x128xf32>
    tpu.vector_store %arg8[%c24_44, %c0_45], %131 {strides = array<i32>} : memref<72x128xf32, #tpu.memory_space<vmem>>, vector<8x128xf32>,
    %c32 = arith.constant 32 : index
    %c0_46 = arith.constant 0 : index
    %133 = vector.load %arg7[%c32, %c0_46] : memref<72x512xf32, #tpu.memory_space<vmem>>, vector<8x512xf32>
    %134 = arith.truncf %131 : vector<8x128xf32> to vector<8x128xbf16>
    %c0_47 = arith.constant 0 : index
    %c0_48 = arith.constant 0 : index
    %135 = vector.load %arg2[%c0_47, %c0_48] : memref<128x512xbf16, #tpu.memory_space<vmem>>, vector<128x512xbf16>
    %cst_49 = arith.constant dense<0.000000e+00> : vector<8x512xf32>
    %136 = tpu.matmul %134, %135, %cst_49 {dimension_numbers = #tpu.dot_dimension_numbers<[1], [0], [0], [1], [0, 0, 1, 1], [], []>} : vector<8x128xbf16>, vector<128x512xbf16>, vector<8x512xf32> -> vector<8x512xf32>
    %137 = arith.addf %133, %136 : vector<8x512xf32>
    %138 = vector.extract_strided_slice %137 {offsets = [0, 0], sizes = [8, 128], strides = [1, 1]} : vector<8x512xf32> to vector<8x128xf32>
    %139 = arith.negf %138 : vector<8x128xf32>
    %140 = math.exp %139 : vector<8x128xf32>
    %cst_50 = arith.constant 1.000000e+00 : f32
    %141 = vector.broadcast %cst_50 : f32 to vector<8x128xf32>
    %142 = arith.addf %141, %140 : vector<8x128xf32>
    %143 = arith.divf %141, %142 : vector<8x128xf32>
    %144 = vector.extract_strided_slice %137 {offsets = [0, 128], sizes = [8, 128], strides = [1, 1]} : vector<8x512xf32> to vector<8x128xf32>
    %145 = arith.negf %144 : vector<8x128xf32>
    %146 = math.exp %145 : vector<8x128xf32>
    %cst_51 = arith.constant 1.000000e+00 : f32
    %147 = vector.broadcast %cst_51 : f32 to vector<8x128xf32>
    %148 = arith.addf %147, %146 : vector<8x128xf32>
    %149 = arith.divf %147, %148 : vector<8x128xf32>
    %150 = vector.extract_strided_slice %137 {offsets = [0, 256], sizes = [8, 128], strides = [1, 1]} : vector<8x512xf32> to vector<8x128xf32>
    %151 = math.tanh %150 : vector<8x128xf32>
    %152 = vector.extract_strided_slice %137 {offsets = [0, 384], sizes = [8, 128], strides = [1, 1]} : vector<8x512xf32> to vector<8x128xf32>
    %153 = arith.negf %152 : vector<8x128xf32>
    %154 = math.exp %153 : vector<8x128xf32>
    %cst_52 = arith.constant 1.000000e+00 : f32
    %155 = vector.broadcast %cst_52 : f32 to vector<8x128xf32>
    %156 = arith.addf %155, %154 : vector<8x128xf32>
    %157 = arith.divf %155, %156 : vector<8x128xf32>
    %158 = arith.mulf %149, %129 : vector<8x128xf32>
    %159 = arith.mulf %143, %151 : vector<8x128xf32>
    %160 = arith.addf %158, %159 : vector<8x128xf32>
    %161 = math.tanh %160 : vector<8x128xf32>
    %162 = arith.mulf %157, %161 : vector<8x128xf32>
    %c32_53 = arith.constant 32 : index
    %c0_54 = arith.constant 0 : index
    %163 = vector.load %arg8[%c32_53, %c0_54] : memref<72x128xf32, #tpu.memory_space<vmem>>, vector<8x128xf32>
    tpu.vector_store %arg8[%c32_53, %c0_54], %162 {strides = array<i32>} : memref<72x128xf32, #tpu.memory_space<vmem>>, vector<8x128xf32>,
    %c40 = arith.constant 40 : index
    %c0_55 = arith.constant 0 : index
    %164 = vector.load %arg7[%c40, %c0_55] : memref<72x512xf32, #tpu.memory_space<vmem>>, vector<8x512xf32>
    %165 = arith.truncf %162 : vector<8x128xf32> to vector<8x128xbf16>
    %c0_56 = arith.constant 0 : index
    %c0_57 = arith.constant 0 : index
    %166 = vector.load %arg2[%c0_56, %c0_57] : memref<128x512xbf16, #tpu.memory_space<vmem>>, vector<128x512xbf16>
    %cst_58 = arith.constant dense<0.000000e+00> : vector<8x512xf32>
    %167 = tpu.matmul %165, %166, %cst_58 {dimension_numbers = #tpu.dot_dimension_numbers<[1], [0], [0], [1], [0, 0, 1, 1], [], []>} : vector<8x128xbf16>, vector<128x512xbf16>, vector<8x512xf32> -> vector<8x512xf32>
    %168 = arith.addf %164, %167 : vector<8x512xf32>
    %169 = vector.extract_strided_slice %168 {offsets = [0, 0], sizes = [8, 128], strides = [1, 1]} : vector<8x512xf32> to vector<8x128xf32>
    %170 = arith.negf %169 : vector<8x128xf32>
    %171 = math.exp %170 : vector<8x128xf32>
    %cst_59 = arith.constant 1.000000e+00 : f32
    %172 = vector.broadcast %cst_59 : f32 to vector<8x128xf32>
    %173 = arith.addf %172, %171 : vector<8x128xf32>
    %174 = arith.divf %172, %173 : vector<8x128xf32>
    %175 = vector.extract_strided_slice %168 {offsets = [0, 128], sizes = [8, 128], strides = [1, 1]} : vector<8x512xf32> to vector<8x128xf32>
    %176 = arith.negf %175 : vector<8x128xf32>
    %177 = math.exp %176 : vector<8x128xf32>
    %cst_60 = arith.constant 1.000000e+00 : f32
    %178 = vector.broadcast %cst_60 : f32 to vector<8x128xf32>
    %179 = arith.addf %178, %177 : vector<8x128xf32>
    %180 = arith.divf %178, %179 : vector<8x128xf32>
    %181 = vector.extract_strided_slice %168 {offsets = [0, 256], sizes = [8, 128], strides = [1, 1]} : vector<8x512xf32> to vector<8x128xf32>
    %182 = math.tanh %181 : vector<8x128xf32>
    %183 = vector.extract_strided_slice %168 {offsets = [0, 384], sizes = [8, 128], strides = [1, 1]} : vector<8x512xf32> to vector<8x128xf32>
    %184 = arith.negf %183 : vector<8x128xf32>
    %185 = math.exp %184 : vector<8x128xf32>
    %cst_61 = arith.constant 1.000000e+00 : f32
    %186 = vector.broadcast %cst_61 : f32 to vector<8x128xf32>
    %187 = arith.addf %186, %185 : vector<8x128xf32>
    %188 = arith.divf %186, %187 : vector<8x128xf32>
    %189 = arith.mulf %180, %160 : vector<8x128xf32>
    %190 = arith.mulf %174, %182 : vector<8x128xf32>
    %191 = arith.addf %189, %190 : vector<8x128xf32>
    %192 = math.tanh %191 : vector<8x128xf32>
    %193 = arith.mulf %188, %192 : vector<8x128xf32>
    %c40_62 = arith.constant 40 : index
    %c0_63 = arith.constant 0 : index
    %194 = vector.load %arg8[%c40_62, %c0_63] : memref<72x128xf32, #tpu.memory_space<vmem>>, vector<8x128xf32>
    tpu.vector_store %arg8[%c40_62, %c0_63], %193 {strides = array<i32>} : memref<72x128xf32, #tpu.memory_space<vmem>>, vector<8x128xf32>,
    %c48 = arith.constant 48 : index
    %c0_64 = arith.constant 0 : index
    %195 = vector.load %arg7[%c48, %c0_64] : memref<72x512xf32, #tpu.memory_space<vmem>>, vector<8x512xf32>
    %196 = arith.truncf %193 : vector<8x128xf32> to vector<8x128xbf16>
    %c0_65 = arith.constant 0 : index
    %c0_66 = arith.constant 0 : index
    %197 = vector.load %arg2[%c0_65, %c0_66] : memref<128x512xbf16, #tpu.memory_space<vmem>>, vector<128x512xbf16>
    %cst_67 = arith.constant dense<0.000000e+00> : vector<8x512xf32>
    %198 = tpu.matmul %196, %197, %cst_67 {dimension_numbers = #tpu.dot_dimension_numbers<[1], [0], [0], [1], [0, 0, 1, 1], [], []>} : vector<8x128xbf16>, vector<128x512xbf16>, vector<8x512xf32> -> vector<8x512xf32>
    %199 = arith.addf %195, %198 : vector<8x512xf32>
    %200 = vector.extract_strided_slice %199 {offsets = [0, 0], sizes = [8, 128], strides = [1, 1]} : vector<8x512xf32> to vector<8x128xf32>
    %201 = arith.negf %200 : vector<8x128xf32>
    %202 = math.exp %201 : vector<8x128xf32>
    %cst_68 = arith.constant 1.000000e+00 : f32
    %203 = vector.broadcast %cst_68 : f32 to vector<8x128xf32>
    %204 = arith.addf %203, %202 : vector<8x128xf32>
    %205 = arith.divf %203, %204 : vector<8x128xf32>
    %206 = vector.extract_strided_slice %199 {offsets = [0, 128], sizes = [8, 128], strides = [1, 1]} : vector<8x512xf32> to vector<8x128xf32>
    %207 = arith.negf %206 : vector<8x128xf32>
    %208 = math.exp %207 : vector<8x128xf32>
    %cst_69 = arith.constant 1.000000e+00 : f32
    %209 = vector.broadcast %cst_69 : f32 to vector<8x128xf32>
    %210 = arith.addf %209, %208 : vector<8x128xf32>
    %211 = arith.divf %209, %210 : vector<8x128xf32>
    %212 = vector.extract_strided_slice %199 {offsets = [0, 256], sizes = [8, 128], strides = [1, 1]} : vector<8x512xf32> to vector<8x128xf32>
    %213 = math.tanh %212 : vector<8x128xf32>
    %214 = vector.extract_strided_slice %199 {offsets = [0, 384], sizes = [8, 128], strides = [1, 1]} : vector<8x512xf32> to vector<8x128xf32>
    %215 = arith.negf %214 : vector<8x128xf32>
    %216 = math.exp %215 : vector<8x128xf32>
    %cst_70 = arith.constant 1.000000e+00 : f32
    %217 = vector.broadcast %cst_70 : f32 to vector<8x128xf32>
    %218 = arith.addf %217, %216 : vector<8x128xf32>
    %219 = arith.divf %217, %218 : vector<8x128xf32>
    %220 = arith.mulf %211, %191 : vector<8x128xf32>
    %221 = arith.mulf %205, %213 : vector<8x128xf32>
    %222 = arith.addf %220, %221 : vector<8x128xf32>
    %223 = math.tanh %222 : vector<8x128xf32>
    %224 = arith.mulf %219, %223 : vector<8x128xf32>
    %c48_71 = arith.constant 48 : index
    %c0_72 = arith.constant 0 : index
    %225 = vector.load %arg8[%c48_71, %c0_72] : memref<72x128xf32, #tpu.memory_space<vmem>>, vector<8x128xf32>
    tpu.vector_store %arg8[%c48_71, %c0_72], %224 {strides = array<i32>} : memref<72x128xf32, #tpu.memory_space<vmem>>, vector<8x128xf32>,
    %c56 = arith.constant 56 : index
    %c0_73 = arith.constant 0 : index
    %226 = vector.load %arg7[%c56, %c0_73] : memref<72x512xf32, #tpu.memory_space<vmem>>, vector<8x512xf32>
    %227 = arith.truncf %224 : vector<8x128xf32> to vector<8x128xbf16>
    %c0_74 = arith.constant 0 : index
    %c0_75 = arith.constant 0 : index
    %228 = vector.load %arg2[%c0_74, %c0_75] : memref<128x512xbf16, #tpu.memory_space<vmem>>, vector<128x512xbf16>
    %cst_76 = arith.constant dense<0.000000e+00> : vector<8x512xf32>
    %229 = tpu.matmul %227, %228, %cst_76 {dimension_numbers = #tpu.dot_dimension_numbers<[1], [0], [0], [1], [0, 0, 1, 1], [], []>} : vector<8x128xbf16>, vector<128x512xbf16>, vector<8x512xf32> -> vector<8x512xf32>
    %230 = arith.addf %226, %229 : vector<8x512xf32>
    %231 = vector.extract_strided_slice %230 {offsets = [0, 0], sizes = [8, 128], strides = [1, 1]} : vector<8x512xf32> to vector<8x128xf32>
    %232 = arith.negf %231 : vector<8x128xf32>
    %233 = math.exp %232 : vector<8x128xf32>
    %cst_77 = arith.constant 1.000000e+00 : f32
    %234 = vector.broadcast %cst_77 : f32 to vector<8x128xf32>
    %235 = arith.addf %234, %233 : vector<8x128xf32>
    %236 = arith.divf %234, %235 : vector<8x128xf32>
    %237 = vector.extract_strided_slice %230 {offsets = [0, 128], sizes = [8, 128], strides = [1, 1]} : vector<8x512xf32> to vector<8x128xf32>
    %238 = arith.negf %237 : vector<8x128xf32>
    %239 = math.exp %238 : vector<8x128xf32>
    %cst_78 = arith.constant 1.000000e+00 : f32
    %240 = vector.broadcast %cst_78 : f32 to vector<8x128xf32>
    %241 = arith.addf %240, %239 : vector<8x128xf32>
    %242 = arith.divf %240, %241 : vector<8x128xf32>
    %243 = vector.extract_strided_slice %230 {offsets = [0, 256], sizes = [8, 128], strides = [1, 1]} : vector<8x512xf32> to vector<8x128xf32>
    %244 = math.tanh %243 : vector<8x128xf32>
    %245 = vector.extract_strided_slice %230 {offsets = [0, 384], sizes = [8, 128], strides = [1, 1]} : vector<8x512xf32> to vector<8x128xf32>
    %246 = arith.negf %245 : vector<8x128xf32>
    %247 = math.exp %246 : vector<8x128xf32>
    %cst_79 = arith.constant 1.000000e+00 : f32
    %248 = vector.broadcast %cst_79 : f32 to vector<8x128xf32>
    %249 = arith.addf %248, %247 : vector<8x128xf32>
    %250 = arith.divf %248, %249 : vector<8x128xf32>
    %251 = arith.mulf %242, %222 : vector<8x128xf32>
    %252 = arith.mulf %236, %244 : vector<8x128xf32>
    %253 = arith.addf %251, %252 : vector<8x128xf32>
    %254 = math.tanh %253 : vector<8x128xf32>
    %255 = arith.mulf %250, %254 : vector<8x128xf32>
    %c56_80 = arith.constant 56 : index
    %c0_81 = arith.constant 0 : index
    %256 = vector.load %arg8[%c56_80, %c0_81] : memref<72x128xf32, #tpu.memory_space<vmem>>, vector<8x128xf32>
    tpu.vector_store %arg8[%c56_80, %c0_81], %255 {strides = array<i32>} : memref<72x128xf32, #tpu.memory_space<vmem>>, vector<8x128xf32>,
    %c64 = arith.constant 64 : index
    %c0_82 = arith.constant 0 : index
    %257 = vector.load %arg7[%c64, %c0_82] : memref<72x512xf32, #tpu.memory_space<vmem>>, vector<8x512xf32>
    %258 = arith.truncf %255 : vector<8x128xf32> to vector<8x128xbf16>
    %c0_83 = arith.constant 0 : index
    %c0_84 = arith.constant 0 : index
    %259 = vector.load %arg2[%c0_83, %c0_84] : memref<128x512xbf16, #tpu.memory_space<vmem>>, vector<128x512xbf16>
    %cst_85 = arith.constant dense<0.000000e+00> : vector<8x512xf32>
    %260 = tpu.matmul %258, %259, %cst_85 {dimension_numbers = #tpu.dot_dimension_numbers<[1], [0], [0], [1], [0, 0, 1, 1], [], []>} : vector<8x128xbf16>, vector<128x512xbf16>, vector<8x512xf32> -> vector<8x512xf32>
    %261 = arith.addf %257, %260 : vector<8x512xf32>
    %262 = vector.extract_strided_slice %261 {offsets = [0, 0], sizes = [8, 128], strides = [1, 1]} : vector<8x512xf32> to vector<8x128xf32>
    %263 = arith.negf %262 : vector<8x128xf32>
    %264 = math.exp %263 : vector<8x128xf32>
    %cst_86 = arith.constant 1.000000e+00 : f32
    %265 = vector.broadcast %cst_86 : f32 to vector<8x128xf32>
    %266 = arith.addf %265, %264 : vector<8x128xf32>
    %267 = arith.divf %265, %266 : vector<8x128xf32>
    %268 = vector.extract_strided_slice %261 {offsets = [0, 128], sizes = [8, 128], strides = [1, 1]} : vector<8x512xf32> to vector<8x128xf32>
    %269 = arith.negf %268 : vector<8x128xf32>
    %270 = math.exp %269 : vector<8x128xf32>
    %cst_87 = arith.constant 1.000000e+00 : f32
    %271 = vector.broadcast %cst_87 : f32 to vector<8x128xf32>
    %272 = arith.addf %271, %270 : vector<8x128xf32>
    %273 = arith.divf %271, %272 : vector<8x128xf32>
    %274 = vector.extract_strided_slice %261 {offsets = [0, 256], sizes = [8, 128], strides = [1, 1]} : vector<8x512xf32> to vector<8x128xf32>
    %275 = math.tanh %274 : vector<8x128xf32>
    %276 = vector.extract_strided_slice %261 {offsets = [0, 384], sizes = [8, 128], strides = [1, 1]} : vector<8x512xf32> to vector<8x128xf32>
    %277 = arith.negf %276 : vector<8x128xf32>
    %278 = math.exp %277 : vector<8x128xf32>
    %cst_88 = arith.constant 1.000000e+00 : f32
    %279 = vector.broadcast %cst_88 : f32 to vector<8x128xf32>
    %280 = arith.addf %279, %278 : vector<8x128xf32>
    %281 = arith.divf %279, %280 : vector<8x128xf32>
    %282 = arith.mulf %273, %253 : vector<8x128xf32>
    %283 = arith.mulf %267, %275 : vector<8x128xf32>
    %284 = arith.addf %282, %283 : vector<8x128xf32>
    %285 = math.tanh %284 : vector<8x128xf32>
    %286 = arith.mulf %281, %285 : vector<8x128xf32>
    %c64_89 = arith.constant 64 : index
    %c0_90 = arith.constant 0 : index
    %287 = vector.load %arg8[%c64_89, %c0_90] : memref<72x128xf32, #tpu.memory_space<vmem>>, vector<8x128xf32>
    tpu.vector_store %arg8[%c64_89, %c0_90], %286 {strides = array<i32>} : memref<72x128xf32, #tpu.memory_space<vmem>>, vector<8x128xf32>,
    %c0_91 = arith.constant 0 : index
    %c0_92 = arith.constant 0 : index
    %288 = vector.load %arg8[%c0_91, %c0_92] : memref<72x128xf32, #tpu.memory_space<vmem>>, vector<72x128xf32>
    %289 = arith.truncf %288 : vector<72x128xf32> to vector<72x128xbf16>
    %c0_93 = arith.constant 0 : index
    %c0_94 = arith.constant 0 : index
    %290 = vector.load %arg4[%c0_93, %c0_94] : memref<128x256xbf16, #tpu.memory_space<vmem>>, vector<128x256xbf16>
    %cst_95 = arith.constant dense<0.000000e+00> : vector<72x256xf32>
    %291 = tpu.matmul %289, %290, %cst_95 {dimension_numbers = #tpu.dot_dimension_numbers<[1], [0], [0], [1], [0, 0, 1, 1], [], []>} : vector<72x128xbf16>, vector<128x256xbf16>, vector<72x256xf32> -> vector<72x256xf32>
    %c0_96 = arith.constant 0 : index
    %c0_97 = arith.constant 0 : index
    %292 = vector.load %arg5[%c0_96, %c0_97] : memref<1x256xf32, #tpu.memory_space<vmem>>, vector<1x256xf32>
    %293 = vector.broadcast %292 : vector<1x256xf32> to vector<72x256xf32>
    %294 = arith.addf %291, %293 : vector<72x256xf32>
    %c0_98 = arith.constant 0 : index
    %c0_99 = arith.constant 0 : index
    %295 = vector.load %arg6[%c0_98, %c0_99] : memref<72x256xf32, #tpu.memory_space<vmem>>, vector<72x256xf32>
    tpu.vector_store %arg6[%c0_98, %c0_99], %294 {strides = array<i32>} : memref<72x256xf32, #tpu.memory_space<vmem>>, vector<72x256xf32>,
    return
  }
}

</mosaic_0001>

<bundles_post_ra>
// kernel: tpu_custom_call.1
= control target key start
LH: loop header
LB: loop body
LE: loop exit
PB: predicated region body
PF: predicated region fallthrough
CT: control target
= control target key end

     0   :  { %11 = vsyncpa [#allocation5], 0  ;;  %s5216_s0 = inlined_call_operand.hbm [shape: bf16[72,128], index: 0, kind: input, shape index: {}]   ;;  %s5217_s1 = inlined_call_operand.hbm [shape: bf16[128,512], index: 1, kind: input, shape index: {}]   ;;  %s5218_s2 = inlined_call_operand.hbm [shape: bf16[128,512], index: 2, kind: input, shape index: {}]   ;;  %s5219_s3 = inlined_call_operand.vmem [shape: f32[1,512], index: 3, kind: input, shape index: {}]   ;;  %s5220_s4 = inlined_call_operand.hbm [shape: bf16[128,256], index: 4, kind: input, shape index: {}]   ;;  %s5221_s5 = inlined_call_operand.vmem [shape: f32[1,256], index: 5, kind: input, shape index: {}]   ;;  %s5222_s6 = inlined_call_operand.hbm [shape: f32[72,256], index: 6, kind: output, shape index: {}]  }
   0x1   :  { %12 = vsyncpa [#allocation8], 0 }
   0x2   :  { %13 = vsyncpa [#allocation11], 0 }
   0x3   :  { %14 = vsyncpa [#allocation6], 0  ;;  %s4415_s21 = smov [#allocation7]   ;;  %s4297_s25 = scalar_lea.hbm %s5217_s1, 4096 }
   0x4   :  { %s32_s22 = sshll.u32 %s4415_s21, 4  ;;  %p4298_p0 = scmp.ne.s32.totalorder %s5217_s1, %s4297_s25  ;;  %s33_s22 = int_to_ptr.vmem [resolvable:$true] %s32_s22 }
   0x5   :  { %p4301_p1 = scmp.lt.u32.totalorder %s4297_s25, %s5217_s1 }
   0x7   :  { %p4303_p2 = pnand %p4301_p1, %p4298_p0 }
   0x9   :  { %4306 = shalt.err (!%p4303_p2)
}
   0xa   :  { %s4307_s30 = scalar_lea.vmem %s33_s22, 4096  ;;  %p4312_p4 = scmp.lt.s32.totalorder %s33_s22, %s33_s22 }
   0xb   :  { %p4308_p3 = scmp.ne.s32.totalorder %s33_s22, %s4307_s30  ;;  %p4313_p5 = scmp.lt.s32.totalorder %s4307_s30, %s4307_s30 }
   0xd   :  { %p4314_p6 = por %p4313_p5, %p4312_p4 }
   0xf   :  { %p4315_p7 = pnand %p4314_p6, %p4308_p3 }
  0x11   :  { %4318 = shalt.err (!%p4315_p7)
}
  0x12   :  { %s4416_s7 = smov 256   ;;  %s4417_s8 = smov 16  }
  0x13   :  { %38 = dma.hbm_to_vmem [thread:$0]  %s5217_s1, 4096, %s33_s22, [#allocation8], %s4416_s7, %s4416_s7, %s4417_s8  }
  0x14   :  { %s4418_s11 = smov [#allocation4]   ;;  %s4319_s15 = scalar_lea.hbm %s5216_s0, 576 }
  0x15   :  { %s20_s12 = sshll.u32 %s4418_s11, 4  ;;  %p4320_p8 = scmp.ne.s32.totalorder %s5216_s0, %s4319_s15  ;;  %s21_s12 = int_to_ptr.vmem [resolvable:$true] %s20_s12 }
  0x16   :  { %p4323_p9 = scmp.lt.u32.totalorder %s4319_s15, %s5216_s0 }
  0x18   :  { %p4325_p10 = pnand %p4323_p9, %p4320_p8 }
  0x1a   :  { %4328 = shalt.err (!%p4325_p10)
}
  0x1b   :  { %s4329_s20 = scalar_lea.vmem %s21_s12, 576  ;;  %p4334_p12 = scmp.lt.s32.totalorder %s21_s12, %s21_s12 }
  0x1c   :  { %p4330_p11 = scmp.ne.s32.totalorder %s21_s12, %s4329_s20  ;;  %p4335_p13 = scmp.lt.s32.totalorder %s4329_s20, %s4329_s20 }
  0x1e   :  { %p4336_p0 = por %p4335_p13, %p4334_p12 }
  0x20   :  { %p4337_p1 = pnand %p4336_p0, %p4330_p11 }
  0x22   :  { %4340 = shalt.err (!%p4337_p1)
}
  0x23   :  { %s4419_s1 = smov 64   ;;  %s4420_s21 = smov 4  }
  0x24   :  { %26 = dma.hbm_to_vmem [thread:$0]  %s5216_s0, 576, %s21_s12, [#allocation5], %s4419_s1, %s4419_s1, %s4420_s21  }
  0x25   :  { %s4421_s24 = smov [#allocation9]   ;;  %s4422_s26 = smov [#allocation10]  }
  0x26   :  { %s44_s25 = sshll.u32 %s4421_s24, 4  ;;  %s58_s27 = sshll.u32 %s4422_s26, 4  ;;  %s45_s25 = int_to_ptr.vmem [resolvable:$true] %s44_s25  ;;  %s4489_s27 = int_to_ptr.vmem [resolvable:$true] %s58_s27 }
  0x27   :  { %s4341_s30 = scalar_lea.hbm %s5218_s2, 4096 }
  0x28   :  { %p4342_p2 = scmp.ne.s32.totalorder %s5218_s2, %s4341_s30  ;;  %p4345_p3 = scmp.lt.u32.totalorder %s4341_s30, %s5218_s2 }
  0x2a   :  { %p4347_p4 = pnand %p4345_p3, %p4342_p2 }
  0x2c   :  { %4350 = shalt.err (!%p4347_p4)
}
  0x2d   :  { %s4351_s0 = scalar_lea.vmem %s45_s25, 4096  ;;  %p4356_p6 = scmp.lt.s32.totalorder %s45_s25, %s45_s25 }
  0x2e   :  { %p4352_p5 = scmp.ne.s32.totalorder %s45_s25, %s4351_s0  ;;  %p4357_p7 = scmp.lt.s32.totalorder %s4351_s0, %s4351_s0 }
  0x30   :  { %p4358_p8 = por %p4357_p7, %p4356_p6 }
  0x32   :  { %p4359_p9 = pnand %p4358_p8, %p4352_p5 }
  0x34   :  { %4362 = shalt.err (!%p4359_p9)
}
  0x35   :  { %50 = dma.hbm_to_vmem [thread:$0]  %s5218_s2, 4096, %s45_s25, [#allocation8], %s4416_s7, %s4416_s7, %s4417_s8  }
  0x36   :  { %s4363_s17 = scalar_lea.hbm %s5220_s4, 2048 }
  0x37   :  { %p4364_p10 = scmp.ne.s32.totalorder %s5220_s4, %s4363_s17  ;;  %p4367_p11 = scmp.lt.u32.totalorder %s4363_s17, %s5220_s4 }
  0x39   :  { %p4369_p12 = pnand %p4367_p11, %p4364_p10 }
  0x3b   :  { %4372 = shalt.err (!%p4369_p12)
}
  0x3c   :  { %s4373_s21 = scalar_lea.vmem %s4489_s27, 2048  ;;  %p4378_p0 = scmp.lt.s32.totalorder %s4489_s27, %s4489_s27 }
  0x3d   :  { %p4374_p13 = scmp.ne.s32.totalorder %s4489_s27, %s4373_s21  ;;  %p4379_p1 = scmp.lt.s32.totalorder %s4373_s21, %s4373_s21 }
  0x3f   :  { %p4380_p2 = por %p4379_p1, %p4378_p0 }
  0x41   :  { %p4381_p3 = pnand %p4380_p2, %p4374_p13 }
  0x43   :  { %4384 = shalt.err (!%p4381_p3)
}
  0x44   :  { %s4423_s2 = smov 128   ;;  %s4424_s22 = smov 8  }
  0x45   :  { %64 = dma.hbm_to_vmem [thread:$0]  %s5220_s4, 2048, %s4489_s27, [#allocation11], %s4423_s2, %s4423_s2, %s4424_s22  }
  0x46   :  { %4407 = dma.done.wait [#allocation5], 576  }
  0x47   :  { %4408 = vsyncadd [#allocation5], 4294966720 }
  0x48   :  { %4409 = dma.done.wait [#allocation8], 8192  }
  0x49   :  { %4410 = vsyncadd [#allocation8], 4294959104 }
  0x4a   :  { %4411 = dma.done.wait [#allocation11], 2048  }
  0x4b   :  { %4412 = vsyncadd [#allocation11], 4294965248  ;;  %v5223_v0 = vmov 0   ;;  %v3932_v1 = vld [vmem:[#allocation7 + $0xc] ss:$16 sps:$4 sm:$0xff]   ;;  %v3966_v36 = vld [vmem:[#allocation4 + $0x8] sm:$0xff]  }
  0x4c   :  { %444 = vmatprep.mubr.bf16.mxu1 %v5223_v0  ;;  %363 = vmatprep.mubr.bf16.mxu0 %v5223_v0  ;;  %v3934_v2 = vld [vmem:[#allocation7 + $0x8] ss:$16 sps:$4 sm:$0xff]   ;;  %v3935_v3 = vld [vmem:[#allocation7 + $0x2c] ss:$16 sps:$4 sm:$0xff]   ;;  %v3963_v11 = vld [vmem:[#allocation7 + $0x4] ss:$16 sps:$4 sm:$0xff]  }
  0x4d   :  { %412 = vmatprep.subr.bf16.mxu1 %v3932_v1  ;;  %v3937_v4 = vld [vmem:[#allocation7 + $0x28] ss:$16 sps:$4 sm:$0xff]   ;;  %v3938_v5 = vld [vmem:[#allocation7 + $0x4c] ss:$16 sps:$4 sm:$0xff]   ;;  %v3965_v12 = vld [vmem:[#allocation7] ss:$16 sps:$4 sm:$0xff]   ;;  %331 = vmatprep.subr.bf16.mxu0 %v3963_v11 }
  0x4e   :  { %413 = vmatpush1.bf16.msra.mxu1 %v3934_v2  ;;  %v3940_v6 = vld [vmem:[#allocation7 + $0x48] ss:$16 sps:$4 sm:$0xff]   ;;  %v3941_v7 = vld [vmem:[#allocation7 + $0x6c] ss:$16 sps:$4 sm:$0xff]   ;;  %v3967_v14 = vld [vmem:[#allocation7 + $0x24] ss:$16 sps:$4 sm:$0xff]   ;;  %332 = vmatpush1.bf16.msra.mxu0 %v3965_v12 }
  0x4f   :  { %414 = vmatprep.subr.bf16.mxu1 %v3935_v3  ;;  %v3943_v8 = vld [vmem:[#allocation7 + $0x68] ss:$16 sps:$4 sm:$0xff]   ;;  %v3944_v9 = vld [vmem:[#allocation7 + $0x8c] ss:$16 sps:$4 sm:$0xff]   ;;  %333 = vmatprep.subr.bf16.mxu0 %v3967_v14  ;;  %v3972_v16 = vld [vmem:[#allocation7 + $0x20] ss:$16 sps:$4 sm:$0xff]  }
  0x50   :  { %v3946_v10 = vld [vmem:[#allocation7 + $0x88] ss:$16 sps:$4 sm:$0xff]   ;;  %v3947_v13 = vld [vmem:[#allocation7 + $0xac] ss:$16 sps:$4 sm:$0xff]   ;;  %v3973_v18 = vld [vmem:[#allocation7 + $0x44] ss:$16 sps:$4 sm:$0xff]  }
  0x51   :  { %v3949_v15 = vld [vmem:[#allocation7 + $0xa8] ss:$16 sps:$4 sm:$0xff]   ;;  %v3950_v17 = vld [vmem:[#allocation7 + $0xcc] ss:$16 sps:$4 sm:$0xff]   ;;  %v3975_v20 = vld [vmem:[#allocation7 + $0x40] ss:$16 sps:$4 sm:$0xff]  }
  0x52   :  { %415 = vmatpush1.bf16.msra.mxu1 %v3937_v4  ;;  %v3952_v19 = vld [vmem:[#allocation7 + $0xc8] ss:$16 sps:$4 sm:$0xff]   ;;  %334 = vmatpush1.bf16.msra.mxu0 %v3972_v16  ;;  %v3980_v21 = vld [vmem:[#allocation7 + $0x64] ss:$16 sps:$4 sm:$0xff]   ;;  %v3953_v22 = vld [vmem:[#allocation7 + $0xec] ss:$16 sps:$4 sm:$0xff]  }
  0x53   :  { %416 = vmatprep.subr.bf16.mxu1 %v3938_v5  ;;  %335 = vmatprep.subr.bf16.mxu0 %v3973_v18  ;;  %v3955_v23 = vld [vmem:[#allocation7 + $0xe8] ss:$16 sps:$4 sm:$0xff]   ;;  %v3982_v24 = vld [vmem:[#allocation7 + $0x60] ss:$16 sps:$4 sm:$0xff]   ;;  %v3986_v25 = vld [vmem:[#allocation7 + $0x84] ss:$16 sps:$4 sm:$0xff]  }
  0x54   :  { %v4525_v26 = vld [vmem:[#allocation9 + $0x4] ss:$16 sps:$4 sm:$0xff]   ;;  %v3956_v27 = vld [vmem:[#allocation4] sm:$0xff]   ;;  %v3979_v44 = vld [vmem:[#allocation4 + $0x10] sm:$0xff]  }
  0x55   :  { %v3988_v28 = vld [vmem:[#allocation7 + $0x80] ss:$16 sps:$4 sm:$0xff]   ;;  %v4530_v30 = vld [vmem:[#allocation9 + $0x24] ss:$16 sps:$4 sm:$0xff]   ;;  %v4579_v53 = vld [vmem:[#allocation9 + $0xc] ss:$16 sps:$4 sm:$0xff]  }
  0x56   :  { %417 = vmatpush1.bf16.msra.mxu1 %v3940_v6  ;;  %336 = vmatpush1.bf16.msra.mxu0 %v3975_v20  ;;  %v4527_v29 = vld [vmem:[#allocation9] ss:$16 sps:$4 sm:$0xff]   ;;  %v3993_v31 = vld [vmem:[#allocation7 + $0xa4] ss:$16 sps:$4 sm:$0xff]   ;;  %v4002_v54 = vld [vmem:[#allocation4 + $0x20] ss:$0 sps:$4 sm:$0xff]  }
  0x57   :  { %418 = vmatprep.subr.bf16.mxu1 %v3941_v7  ;;  %337 = vmatprep.subr.bf16.mxu0 %v3980_v21  ;;  %v4532_v32 = vld [vmem:[#allocation9 + $0x20] ss:$16 sps:$4 sm:$0xff]   ;;  %v3996_v34 = vld [vmem:[#allocation7 + $0xc4] ss:$16 sps:$4 sm:$0xff]   ;;  %v4595_v55 = vld [vmem:[#allocation9 + $0x8] ss:$16 sps:$4 sm:$0xff]  }
  0x58   :  { %v3995_v33 = vld [vmem:[#allocation7 + $0xa0] ss:$16 sps:$4 sm:$0xff]   ;;  %v4537_v35 = vld [vmem:[#allocation9 + $0x44] ss:$16 sps:$4 sm:$0xff]   ;;  %v4597_v56 = vld [vmem:[#allocation9 + $0x2c] ss:$16 sps:$4 sm:$0xff]  }
  0x59   :  { %v4001_v37 = vld [vmem:[#allocation7 + $0xc0] ss:$16 sps:$4 sm:$0xff]   ;;  %v4543_v39 = vld [vmem:[#allocation9 + $0x64] ss:$16 sps:$4 sm:$0xff]   ;;  %v4604_v57 = vld [vmem:[#allocation9 + $0x28] ss:$16 sps:$4 sm:$0xff]  }
  0x5a   :  { %419 = vmatpush1.bf16.msra.mxu1 %v3943_v8  ;;  %338 = vmatpush1.bf16.msra.mxu0 %v3982_v24  ;;  %v4540_v38 = vld [vmem:[#allocation9 + $0x40] ss:$16 sps:$4 sm:$0xff]   ;;  %v4003_v40 = vld [vmem:[#allocation7 + $0xe4] ss:$16 sps:$4 sm:$0xff]   ;;  %v4608_v58 = vld [vmem:[#allocation9 + $0x4c] ss:$16 sps:$4 sm:$0xff]  }
  0x5b   :  { %420 = vmatprep.subr.bf16.mxu1 %v3944_v9  ;;  %339 = vmatprep.subr.bf16.mxu0 %v3986_v25  ;;  %v4005_v41 = vld [vmem:[#allocation7 + $0xe0] ss:$16 sps:$4 sm:$0xff]   ;;  %v4550_v43 = vld [vmem:[#allocation9 + $0x84] ss:$16 sps:$4 sm:$0xff]   ;;  %v4613_v59 = vld [vmem:[#allocation9 + $0x48] ss:$16 sps:$4 sm:$0xff]  }
  0x5c   :  { %v4547_v42 = vld [vmem:[#allocation9 + $0x60] ss:$16 sps:$4 sm:$0xff]   ;;  %v4555_v46 = vld [vmem:[#allocation9 + $0xa4] ss:$16 sps:$4 sm:$0xff]   ;;  %v4616_v60 = vld [vmem:[#allocation9 + $0x6c] ss:$16 sps:$4 sm:$0xff]  }
  0x5d   :  { %v4553_v45 = vld [vmem:[#allocation9 + $0x80] ss:$16 sps:$4 sm:$0xff]   ;;  %v4561_v48 = vld [vmem:[#allocation9 + $0xc4] ss:$16 sps:$4 sm:$0xff]   ;;  %v4622_v61 = vld [vmem:[#allocation9 + $0x68] ss:$16 sps:$4 sm:$0xff]  }
  0x5e   :  { %421 = vmatpush1.bf16.msra.mxu1 %v3946_v10  ;;  %340 = vmatpush1.bf16.msra.mxu0 %v3988_v28  ;;  %v4559_v47 = vld [vmem:[#allocation9 + $0xa0] ss:$16 sps:$4 sm:$0xff]   ;;  %v3989_v49 = vld [vmem:[#allocation4 + $0x18] sm:$0xff]   ;;  %v4625_v62 = vld [vmem:[#allocation9 + $0x8c] ss:$16 sps:$4 sm:$0xff]  }
  0x5f   :  { %422 = vmatprep.subr.bf16.mxu1 %v3947_v13  ;;  %341 = vmatprep.subr.bf16.mxu0 %v3993_v31  ;;  %v4568_v50 = vld [vmem:[#allocation9 + $0xc0] ss:$16 sps:$4 sm:$0xff]   ;;  %v4571_v51 = vld [vmem:[#allocation9 + $0xe4] ss:$16 sps:$4 sm:$0xff]   ;;  %v4628_v63 = vld [vmem:[#allocation9 + $0x88] ss:$16 sps:$4 sm:$0xff]  }
  0x60   :  { %v4577_v52 = vld [vmem:[#allocation9 + $0xe0] ss:$16 sps:$4 sm:$0xff]   ;;  %v4631_v1 = vld [vmem:[#allocation9 + $0xac] ss:$16 sps:$4 sm:$0xff]   ;;  %v4634_v2 = vld [vmem:[#allocation9 + $0xa8] ss:$16 sps:$4 sm:$0xff]  }
  0x61   :  { %v4637_v3 = vld [vmem:[#allocation9 + $0xcc] ss:$16 sps:$4 sm:$0xff]   ;;  %v4640_v4 = vld [vmem:[#allocation9 + $0xc8] ss:$16 sps:$4 sm:$0xff]  }
  0x62   :  { %423 = vmatpush1.bf16.msra.mxu1 %v3949_v15  ;;  %342 = vmatpush1.bf16.msra.mxu0 %v3995_v33  ;;  %v4643_v5 = vld [vmem:[#allocation9 + $0xec] ss:$16 sps:$4 sm:$0xff]   ;;  %v4646_v6 = vld [vmem:[#allocation9 + $0xe8] ss:$16 sps:$4 sm:$0xff]  }
  0x63   :  { %424 = vmatprep.subr.bf16.mxu1 %v3950_v17  ;;  %343 = vmatprep.subr.bf16.mxu0 %v3996_v34 }
  0x66   :  { %425 = vmatpush1.bf16.msra.mxu1 %v3952_v19  ;;  %344 = vmatpush1.bf16.msra.mxu0 %v4001_v37 }
  0x67   :  { %426 = vmatprep.subr.bf16.mxu1 %v3953_v22  ;;  %345 = vmatprep.subr.bf16.mxu0 %v4003_v40 }
  0x6a   :  { %427 = vmatpush1.bf16.msra.mxu1 %v3955_v23  ;;  %346 = vmatpush1.bf16.msra.mxu0 %v4005_v41  ;;  %v123_v23 = vlaneseq }
  0x6b   :  { %725 = vmatprep.subr.bf16.mxu1 %v4525_v26  ;;  %1033 = vmatprep.subr.bf16.mxu0 %v4525_v26 }
  0x6c   :  { %v4707_v34 = vshrl.u32 %v123_v23, 7 }
  0x6d   :  { %445 = vmatmul.mubr.bf16.vlgmr.msra.gmra.mrb[0].mxu1 %v3956_v27  ;;  %364 = vmatmul.mubr.bf16.vlgmr.msra.gmra.mrb[0].mxu0 %v3956_v27 }
  0x6e   :  { %726 = vmatpush1.bf16.msra.mxu1 %v4527_v29  ;;  %454 = vmatprep.mubr.bf16.mxu1 %v5223_v0  ;;  %5238 = vst [vmem:[#allocation26_spill] sm:$0xff] %v4707_v34  ;;  %v5225_v37 = vsub.s32 0, %v4707_v34  ;;  %v5226_v40 = vsub.s32 1, %v4707_v34 }
  0x6f   :  { %727 = vmatprep.subr.bf16.mxu1 %v4530_v30  ;;  %1034 = vmatpush1.bf16.msra.mxu0 %v4527_v29 }
  0x70   :  { %373 = vmatprep.mubr.bf16.mxu0 %v5223_v0  ;;  %1035 = vmatprep.subr.bf16.mxu0 %v4530_v30 }
  0x72   :  { %728 = vmatpush1.bf16.msra.mxu1 %v4532_v32 }
  0x73   :  { %729 = vmatprep.subr.bf16.mxu1 %v4537_v35  ;;  %1036 = vmatpush1.bf16.msra.mxu0 %v4532_v32 }
  0x74   :  { %1037 = vmatprep.subr.bf16.mxu0 %v4537_v35 }
  0x75   :  { %455 = vmatmul.mubr.bf16.gmra.mrb[4].mxu1 %v3966_v36  ;;  %374 = vmatmul.mubr.bf16.gmra.mrb[4].mxu0 %v3966_v36 }
  0x76   :  { %730 = vmatpush1.bf16.msra.mxu1 %v4540_v38  ;;  %464 = vmatprep.mubr.bf16.mxu1 %v5223_v0 }
  0x77   :  { %731 = vmatprep.subr.bf16.mxu1 %v4543_v39  ;;  %1038 = vmatpush1.bf16.msra.mxu0 %v4540_v38 }
  0x78   :  { %383 = vmatprep.mubr.bf16.mxu0 %v5223_v0  ;;  %1039 = vmatprep.subr.bf16.mxu0 %v4543_v39 }
  0x7a   :  { %732 = vmatpush1.bf16.msra.mxu1 %v4547_v42 }
  0x7b   :  { %733 = vmatprep.subr.bf16.mxu1 %v4550_v43  ;;  %1040 = vmatpush1.bf16.msra.mxu0 %v4547_v42 }
  0x7c   :  { %1041 = vmatprep.subr.bf16.mxu0 %v4550_v43 }
  0x7d   :  { %465 = vmatmul.mubr.bf16.gmra.mrb[8].mxu1 %v3979_v44  ;;  %384 = vmatmul.mubr.bf16.gmra.mrb[8].mxu0 %v3979_v44  ;;  %v121_v44 = vld [vmem:[%s5219_s3] sm:$0xf] }
  0x7e   :  { %734 = vmatpush1.bf16.msra.mxu1 %v4553_v45  ;;  %474 = vmatprep.mubr.bf16.mxu1 %v5223_v0 }
  0x7f   :  { %735 = vmatprep.subr.bf16.mxu1 %v4555_v46  ;;  %393 = vmatprep.mubr.bf16.mxu0 %v5223_v0 }
  0x80   :  { %1042 = vmatpush1.bf16.msra.mxu0 %v4553_v45 }
  0x81   :  { %1043 = vmatprep.subr.bf16.mxu0 %v4555_v46 }
  0x82   :  { %736 = vmatpush1.bf16.msra.mxu1 %v4559_v47 }
  0x83   :  { %737 = vmatprep.subr.bf16.mxu1 %v4561_v48 }
  0x84   :  { %1044 = vmatpush1.bf16.msra.mxu0 %v4559_v47 }
  0x85   :  { %475 = vmatmul.mubr.bf16.gmra.mrb[12].mxu1 %v3989_v49  ;;  %1045 = vmatprep.subr.bf16.mxu0 %v4561_v48 }
  0x86   :  { %484 = vmatprep.mubr.bf16.mxu1 %v5223_v0  ;;  %738 = vmatpush1.bf16.msra.mxu1 %v4568_v50 }
  0x87   :  { %739 = vmatprep.subr.bf16.mxu1 %v4571_v51  ;;  %394 = vmatmul.mubr.bf16.gmra.mrb[12].mxu0 %v3989_v49 }
  0x88   :  { %403 = vmatprep.mubr.bf16.mxu0 %v5223_v0  ;;  %1046 = vmatpush1.bf16.msra.mxu0 %v4568_v50 }
  0x89   :  { %1047 = vmatprep.subr.bf16.mxu0 %v4571_v51 }
  0x8a   :  { %740 = vmatpush1.bf16.msra.mxu1 %v4577_v52 }
  0x8b   :  { %766 = vmatprep.subr.bf16.mxu1 %v4579_v53 }
  0x8c   :  { %1048 = vmatpush1.bf16.msra.mxu0 %v4577_v52 }
  0x8d   :  { %485 = vmatmul.mubr.bf16.gmra.mrb[16].mxu1 %v4002_v54  ;;  %1341 = vmatprep.subr.bf16.mxu0 %v4525_v26 }
  0x8e   :  { %757 = vmatprep.mubr.bf16.mxu1 %v5223_v0 }
  0x8f   :  { %404 = vmatmul.mubr.bf16.gmra.mrb[16].mxu0 %v4002_v54  ;;  %v4722_v54 = vrot.slane %v121_v44, %v5225_v37 }
  0x90   :  { %1065 = vmatprep.mubr.bf16.mxu0 %v5223_v0 }
  0x95   :  { %758 = vmatmul.mubr.bf16.vlgmr.msra.gmra.mrb[20].mxu1 %v5223_v0 }
  0x96   :  { %767 = vmatpush1.bf16.msra.mxu1 %v4595_v55  ;;  %798 = vmatprep.mubr.bf16.mxu1 %v5223_v0 }
  0x97   :  { %768 = vmatprep.subr.bf16.mxu1 %v4597_v56 }
  0x9a   :  { %769 = vmatpush1.bf16.msra.mxu1 %v4604_v57 }
  0x9b   :  { %770 = vmatprep.subr.bf16.mxu1 %v4608_v58 }
  0x9e   :  { %771 = vmatpush1.bf16.msra.mxu1 %v4613_v59 }
  0x9f   :  { %772 = vmatprep.subr.bf16.mxu1 %v4616_v60 }
  0xa2   :  { %773 = vmatpush1.bf16.msra.mxu1 %v4622_v61 }
  0xa3   :  { %774 = vmatprep.subr.bf16.mxu1 %v4625_v62 }
  0xa6   :  { %775 = vmatpush1.bf16.msra.mxu1 %v4628_v63 }
  0xa7   :  { %776 = vmatprep.subr.bf16.mxu1 %v4631_v1 }
  0xaa   :  { %777 = vmatpush1.bf16.msra.mxu1 %v4634_v2 }
  0xab   :  { %778 = vmatprep.subr.bf16.mxu1 %v4637_v3 }
  0xae   :  { %779 = vmatpush1.bf16.msra.mxu1 %v4640_v4 }
  0xaf   :  { %780 = vmatprep.subr.bf16.mxu1 %v4643_v5 }
  0xb2   :  { %781 = vmatpush1.bf16.msra.mxu1 %v4646_v6 }
  0xb3   :  { %1074 = vmatprep.subr.bf16.mxu1 %v4579_v53 }
  0xb5   :  { %799 = vmatmul.mubr.bf16.vlgmr.msra.gmra.mrb[24].mxu1 %v5223_v0 }
  0xb6   :  { %1075 = vmatpush1.bf16.msra.mxu1 %v4595_v55  ;;  %1106 = vmatprep.mubr.bf16.mxu1 %v5223_v0  ;;  %v4728_v0 = vrot.slane %v121_v44, %v5226_v40 }
  0xb7   :  { %1076 = vmatprep.subr.bf16.mxu1 %v4597_v56 }
  0xba   :  { %1077 = vmatpush1.bf16.msra.mxu1 %v4604_v57 }
  0xbb   :  { %1078 = vmatprep.subr.bf16.mxu1 %v4608_v58 }
  0xbe   :  { %1079 = vmatpush1.bf16.msra.mxu1 %v4613_v59 }
  0xbf   :  { %1080 = vmatprep.subr.bf16.mxu1 %v4616_v60 }
  0xc2   :  { %1081 = vmatpush1.bf16.msra.mxu1 %v4622_v61 }
  0xc3   :  { %1082 = vmatprep.subr.bf16.mxu1 %v4625_v62 }
  0xc6   :  { %1083 = vmatpush1.bf16.msra.mxu1 %v4628_v63 }
  0xc7   :  { %1084 = vmatprep.subr.bf16.mxu1 %v4631_v1 }
  0xca   :  { %1085 = vmatpush1.bf16.msra.mxu1 %v4634_v2 }
  0xcb   :  { %1086 = vmatprep.subr.bf16.mxu1 %v4637_v3 }
  0xce   :  { %1087 = vmatpush1.bf16.msra.mxu1 %v4640_v4 }
  0xcf   :  { %1088 = vmatprep.subr.bf16.mxu1 %v4643_v5 }
  0xd2   :  { %1089 = vmatpush1.bf16.msra.mxu1 %v4646_v6 }
  0xd3   :  { %1382 = vmatprep.subr.bf16.mxu1 %v4579_v53 }
 0x140   :  { %v446_v7 = vpop.f32.mrb[0].mxu1  ;;  %v365_v15 = vpop.f32.mrb[0].mxu0 }
 0x141   :  { %v448_v8 = vpop.f32.mrb[1].mxu1  ;;  %v367_v17 = vpop.f32.mrb[1].mxu0 }
 0x142   :  { %v4669_v9 = vpop.f32.mrb[2].mxu1  ;;  %v4685_v19 = vpop.f32.mrb[2].mxu0 }
 0x143   :  { %v4671_v10 = vpop.f32.mrb[3].mxu1  ;;  %v4689_v21 = vpop.f32.mrb[3].mxu0 }
 0x148   :  { %v4673_v11 = vpop.f32.mrb[4].mxu1  ;;  %v4693_v24 = vpop.f32.mrb[4].mxu0 }
 0x149   :  { %v4675_v12 = vpop.f32.mrb[5].mxu1  ;;  %v4697_v26 = vpop.f32.mrb[5].mxu0 }
 0x14a   :  { %v4677_v13 = vpop.f32.mrb[6].mxu1  ;;  %v4701_v28 = vpop.f32.mrb[6].mxu0 }
 0x14b   :  { %v4679_v14 = vpop.f32.mrb[7].mxu1  ;;  %v4705_v33 = vpop.f32.mrb[7].mxu0 }
 0x14c   :  { %5229 = vst [vmem:[#allocation17_spill] sm:$0xff] %v4679_v14  ;;  %5237 = vst [vmem:[#allocation25_spill] sm:$0xff] %v4705_v33 }
 0x150   :  { %v4681_v16 = vpop.f32.mrb[8].mxu1  ;;  %v4713_v41 = vpop.f32.mrb[8].mxu0 }
 0x151   :  { %5230 = vst [vmem:[#allocation18_spill] sm:$0xff] %v4681_v16  ;;  %v4683_v18 = vpop.f32.mrb[9].mxu1  ;;  %5240 = vst [vmem:[#allocation28_spill] sm:$0xff] %v4713_v41  ;;  %v4718_v49 = vpop.f32.mrb[9].mxu0 }
 0x152   :  { %5231 = vst [vmem:[#allocation19_spill] sm:$0xff] %v4683_v18  ;;  %v4687_v20 = vpop.f32.mrb[10].mxu1  ;;  %5241 = vst [vmem:[#allocation29_spill] sm:$0xff] %v4718_v49  ;;  %v4724_v23 = vpop.f32.mrb[10].mxu0 }
 0x153   :  { %5232 = vst [vmem:[#allocation20_spill] sm:$0xff] %v4687_v20  ;;  %v4691_v22 = vpop.f32.mrb[11].mxu1  ;;  %5242 = vst [vmem:[#allocation30_spill] sm:$0xff] %v4724_v23 }
 0x154   :  { %5233 = vst [vmem:[#allocation21_spill] sm:$0xff] %v4691_v22 }
 0x158   :  { %v4695_v25 = vpop.f32.mrb[12].mxu1 }
 0x159   :  { %5234 = vst [vmem:[#allocation22_spill] sm:$0xff] %v4695_v25  ;;  %v4699_v27 = vpop.f32.mrb[13].mxu1 }
 0x15a   :  { %5235 = vst [vmem:[#allocation23_spill] sm:$0xff] %v4699_v27  ;;  %v4703_v31 = vpop.f32.mrb[14].mxu1  ;;  %v368_v27 = vadd.f32 %v367_v17, %v4728_v0  ;;  %v137_v17 = vsub.s32 3, %v4707_v34 }
 0x15b   :  { %5236 = vst [vmem:[#allocation24_spill] sm:$0xff] %v4703_v31  ;;  %v4709_v36 = vpop.f32.mrb[15].mxu1  ;;  %v366_v31 = vadd.f32 %v365_v15, %v4722_v54  ;;  %v133_v15 = vsub.s32 2, %v4707_v34 }
 0x15c   :  { %5239 = vst [vmem:[#allocation27_spill] sm:$0xff] %v4709_v36  ;;  %v4730_v36 = vpop.f32.mrb[11].mxu0 }
 0x15d   :  { %5243 = vst [vmem:[#allocation31_spill] sm:$0xff] %v4730_v36  ;;  %v4734_v25 = vpop.f32.mrb[12].mxu0 }
 0x15e   :  { %5244 = vst [vmem:[#allocation32_spill] sm:$0xff] %v4734_v25  ;;  %v4736_v20 = vpop.f32.mrb[13].mxu0 }
 0x15f   :  { %5245 = vst [vmem:[#allocation33_spill] sm:$0xff] %v4736_v20  ;;  %v4738_v18 = vpop.f32.mrb[14].mxu0  ;;  %v4744_v20 = vrot.slane %v121_v44, %v133_v15 }
 0x160   :  { %5246 = vst [vmem:[#allocation34_spill] sm:$0xff] %v4738_v18  ;;  %v4740_v16 = vpop.f32.mrb[15].mxu0 }
 0x161   :  { %5247 = vst [vmem:[#allocation35_spill] sm:$0xff] %v4740_v16 }
 0x168   :  { %v759_v22 = vpop.f32.mrb[20].mxu1 }
 0x169   :  { %v807_v49 = vadd.f32 %v759_v22, %v366_v31  ;;  %v761_v37 = vpop.f32.mrb[21].mxu1  ;;  %v4746_v22 = vrot.slane %v121_v44, %v137_v17 }
 0x16a   :  { %v808_v23 = vadd.f32 %v761_v37, %v368_v27  ;;  %v763_v41 = vpop.f32.mrb[22].mxu1  ;;  %v447_v37 = vadd.f32 %v446_v7, %v4744_v20 }
 0x16b   :  { %v764_v40 = vpop.f32.mrb[23].mxu1  ;;  %v3609_v36 = vmul.f32 -1.442695, %v807_v49 }
 0x16c   :  { %v3610_v33 = vmul.f32 -1.442695, %v808_v23  ;;  %v449_v40 = vadd.f32 %v448_v8, %v4746_v22 }
 0x16e   :  { %4153 = vpow2.f32 %v3610_v33 }
 0x16f   :  { %4155 = vpow2.f32 %v3609_v36 }
 0x178   :  { %v4154_v25 = vpop.eup %4153 }
 0x179   :  { %v4156_v14 = vpop.eup %4155  ;;  %v820_v31 = vadd.f32 1.0, %v4154_v25 }
 0x17a   :  { %v814_v27 = vadd.f32 1.0, %v4156_v14 }
 0x17b   :  { %4157 = vrcp.f32 %v820_v31 }
 0x17c   :  { %4159 = vrcp.f32 %v814_v27 }
 0x185   :  { %v4158_v15 = vpop.eup %4157 }
 0x186   :  { %v4160_v44 = vpop.eup %4159  ;;  %v830_v25 = vmul.f32 0.0, %v4158_v15 }
 0x188   :  { %v800_v41 = vpop.f32.mrb[24].mxu1 }
 0x189   :  { %v809_v33 = vadd.f32 %v800_v41, %v447_v37  ;;  %v802_v36 = vpop.f32.mrb[25].mxu1 }
 0x18a   :  { %v810_v49 = vadd.f32 %v802_v36, %v449_v40  ;;  %v804_v23 = vpop.f32.mrb[26].mxu1 }
 0x18b   :  { %4161 = vtanh.f32 %v809_v33  ;;  %v805_v34 = vpop.f32.mrb[27].mxu1 }
 0x18c   :  { %v3611_v16 = vmul.f32 -1.442695, %v810_v49 }
 0x18e   :  { %4163 = vpow2.f32 %v3611_v16  ;;  %v5248_v16 = vmov 0  }
 0x195   :  { %v4162_v17 = vpop.eup %4161 }
 0x196   :  { %v831_v14 = vmul.f32 %v4162_v17, %v4160_v44 }
 0x198   :  { %v4164_v18 = vpop.eup %4163  ;;  %v4750_v7 = vadd.f32 %v831_v14, %v830_v25 }
 0x199   :  { %v827_v8 = vadd.f32 1.0, %v4164_v18 }
 0x19a   :  { %4165 = vtanh.f32 %v4750_v7 }
 0x19b   :  { %4167 = vrcp.f32 %v827_v8 }
 0x1a4   :  { %v4166_v31 = vpop.eup %4165 }
 0x1a5   :  { %v4168_v27 = vpop.eup %4167 }
 0x1a6   :  { %v4753_v37 = vmul.f32 %v4168_v27, %v4166_v31 }
 0x1a8   :  { %v840_v34 = vpack.c.bf16 %v4753_v37, %v4753_v37 }
 0x1aa   :  { %1066 = vmatmul.mubr.bf16.vlgmr.msra.gmra.mrb[20].mxu0 %v840_v34  ;;  %1107 = vmatmul.mubr.bf16.vlgmr.msra.gmra.mrb[28].mxu1 %v840_v34  ;;  %v457_v34 = vadd.f32 %v4673_v11, %v4744_v20 }
 0x1ab   :  { %1342 = vmatpush1.bf16.msra.mxu0 %v4527_v29  ;;  %1383 = vmatpush1.bf16.msra.mxu1 %v4595_v55  ;;  %v451_v29 = vadd.f32 %v4669_v9, %v4744_v20 }
 0x1ac   :  { %1343 = vmatprep.subr.bf16.mxu0 %v4530_v30  ;;  %1384 = vmatprep.subr.bf16.mxu1 %v4597_v56  ;;  %v370_v30 = vadd.f32 %v4685_v19, %v4722_v54 }
 0x1ad   :  { %1373 = vmatprep.mubr.bf16.mxu0 %v5248_v16  ;;  %1414 = vmatprep.mubr.bf16.mxu1 %v5248_v16 }
 0x1af   :  { %1344 = vmatpush1.bf16.msra.mxu0 %v4532_v32  ;;  %1385 = vmatpush1.bf16.msra.mxu1 %v4604_v57  ;;  %v453_v32 = vadd.f32 %v4671_v10, %v4746_v22 }
 0x1b0   :  { %1345 = vmatprep.subr.bf16.mxu0 %v4537_v35  ;;  %1386 = vmatprep.subr.bf16.mxu1 %v4608_v58  ;;  %v372_v35 = vadd.f32 %v4689_v21, %v4728_v0 }
 0x1b3   :  { %1346 = vmatpush1.bf16.msra.mxu0 %v4540_v38  ;;  %1387 = vmatpush1.bf16.msra.mxu1 %v4613_v59 }
 0x1b4   :  { %1347 = vmatprep.subr.bf16.mxu0 %v4543_v39  ;;  %1388 = vmatprep.subr.bf16.mxu1 %v4616_v60 }
 0x1b7   :  { %1348 = vmatpush1.bf16.msra.mxu0 %v4547_v42  ;;  %1389 = vmatpush1.bf16.msra.mxu1 %v4622_v61 }
 0x1b8   :  { %1349 = vmatprep.subr.bf16.mxu0 %v4550_v43  ;;  %1390 = vmatprep.subr.bf16.mxu1 %v4625_v62 }
 0x1bb   :  { %1350 = vmatpush1.bf16.msra.mxu0 %v4553_v45  ;;  %1391 = vmatpush1.bf16.msra.mxu1 %v4628_v63 }
 0x1bc   :  { %1351 = vmatprep.subr.bf16.mxu0 %v4555_v46  ;;  %1392 = vmatprep.subr.bf16.mxu1 %v4631_v1 }
 0x1bf   :  { %1352 = vmatpush1.bf16.msra.mxu0 %v4559_v47  ;;  %1393 = vmatpush1.bf16.msra.mxu1 %v4634_v2 }
 0x1c0   :  { %1353 = vmatprep.subr.bf16.mxu0 %v4561_v48  ;;  %1394 = vmatprep.subr.bf16.mxu1 %v4637_v3 }
 0x1c3   :  { %1354 = vmatpush1.bf16.msra.mxu0 %v4568_v50  ;;  %1395 = vmatpush1.bf16.msra.mxu1 %v4640_v4 }
 0x1c4   :  { %1355 = vmatprep.subr.bf16.mxu0 %v4571_v51  ;;  %1396 = vmatprep.subr.bf16.mxu1 %v4643_v5 }
 0x1c7   :  { %1356 = vmatpush1.bf16.msra.mxu0 %v4577_v52  ;;  %1397 = vmatpush1.bf16.msra.mxu1 %v4646_v6 }
 0x1c8   :  { %1690 = vmatprep.subr.bf16.mxu1 %v4579_v53 }
 0x27d   :  { %v1067_v38 = vpop.f32.mrb[20].mxu0  ;;  %v1108_v39 = vpop.f32.mrb[28].mxu1 }
 0x27e   :  { %v1115_v42 = vadd.f32 %v1067_v38, %v370_v30  ;;  %v1117_v43 = vadd.f32 %v1108_v39, %v451_v29  ;;  %v1069_v45 = vpop.f32.mrb[21].mxu0  ;;  %v1110_v46 = vpop.f32.mrb[29].mxu1  ;;  %v376_v29 = vadd.f32 %v4693_v24, %v4722_v54  ;;  %v459_v30 = vadd.f32 %v4675_v12, %v4746_v22 }
 0x27f   :  { %v1116_v47 = vadd.f32 %v1069_v45, %v372_v35  ;;  %v1118_v48 = vadd.f32 %v1110_v46, %v453_v32  ;;  %v1071_v50 = vpop.f32.mrb[22].mxu0  ;;  %v1112_v51 = vpop.f32.mrb[30].mxu1  ;;  %v378_v32 = vadd.f32 %v4697_v26, %v4728_v0 }
 0x280   :  { %v3644_v52 = vmul.f32 -1.442695, %v1115_v42  ;;  %v1072_v53 = vpop.f32.mrb[23].mxu0  ;;  %v1113_v9 = vpop.f32.mrb[31].mxu1 }
 0x281   :  { %v3645_v18 = vmul.f32 -1.442695, %v1116_v47  ;;  %v3646_v10 = vmul.f32 -1.442695, %v1118_v48 }
 0x282   :  { %4169 = vpow2.f32 %v3644_v52 }
 0x283   :  { %4171 = vpow2.f32 %v3645_v18 }
 0x284   :  { %4173 = vpow2.f32 %v3646_v10 }
 0x285   :  { %4175 = vtanh.f32 %v1117_v43 }
 0x28c   :  { %v4170_v19 = vpop.eup %4169 }
 0x28d   :  { %v4172_v40 = vpop.eup %4171  ;;  %v1122_v21 = vadd.f32 1.0, %v4170_v19 }
 0x28e   :  { %v1128_v41 = vadd.f32 1.0, %v4172_v40  ;;  %v4174_v33 = vpop.eup %4173 }
 0x28f   :  { %4177 = vrcp.f32 %v1122_v21  ;;  %v4176_v36 = vpop.eup %4175  ;;  %v1135_v44 = vadd.f32 1.0, %v4174_v33 }
 0x290   :  { %4179 = vrcp.f32 %v1128_v41 }
 0x291   :  { %4181 = vrcp.f32 %v1135_v44 }
 0x299   :  { %v4178_v49 = vpop.eup %4177 }
 0x29a   :  { %v4180_v23 = vpop.eup %4179  ;;  %v1139_v15 = vmul.f32 %v4178_v49, %v4176_v36 }
 0x29b   :  { %v1138_v17 = vmul.f32 %v4180_v23, %v4750_v7  ;;  %v4182_v14 = vpop.eup %4181  ;;  %v4867_v7 = vld [vmem:[#allocation9 + $0xe0] ss:$16 sps:$4 sm:$0xff]  }
 0x29d   :  { %v4799_v25 = vadd.f32 %v1139_v15, %v1138_v17 }
 0x29f   :  { %4183 = vtanh.f32 %v4799_v25 }
 0x2a9   :  { %v4184_v8 = vpop.eup %4183 }
 0x2aa   :  { %v4802_v31 = vmul.f32 %v4184_v8, %v4182_v14  ;;  %v4908_v14 = vld [vmem:[#allocation9 + $0x8] ss:$16 sps:$4 sm:$0xff]   ;;  %v4912_v8 = vld [vmem:[#allocation9 + $0x2c] ss:$16 sps:$4 sm:$0xff]  }
 0x2ac   :  { %v1148_v27 = vpack.c.bf16 %v4802_v31, %v4802_v31 }
 0x2ae   :  { %1374 = vmatmul.mubr.bf16.vlgmr.msra.gmra.mrb[24].mxu0 %v1148_v27  ;;  %1415 = vmatmul.mubr.bf16.vlgmr.msra.gmra.mrb[32].mxu1 %v1148_v27  ;;  %v4914_v27 = vld [vmem:[#allocation9 + $0x28] ss:$16 sps:$4 sm:$0xff]  }
 0x2af   :  { %1691 = vmatpush1.bf16.msra.mxu1 %v4595_v55  ;;  %1681 = vmatprep.mubr.bf16.mxu0 %v5248_v16  ;;  %v4823_v55 = vld [vmem:[#allocation9 + $0x4] ss:$16 sps:$4 sm:$0xff]  }
 0x2b0   :  { %1692 = vmatprep.subr.bf16.mxu1 %v4597_v56  ;;  %1722 = vmatprep.mubr.bf16.mxu1 %v5248_v16  ;;  %v4825_v56 = vld [vmem:[#allocation9] ss:$16 sps:$4 sm:$0xff]  }
 0x2b1   :  { %1649 = vmatprep.subr.bf16.mxu0 %v4823_v55 }
 0x2b2   :  { %1650 = vmatpush1.bf16.msra.mxu0 %v4825_v56 }
 0x2b3   :  { %1693 = vmatpush1.bf16.msra.mxu1 %v4604_v57  ;;  %v4829_v57 = vld [vmem:[#allocation9 + $0x24] ss:$16 sps:$4 sm:$0xff]  }
 0x2b4   :  { %1694 = vmatprep.subr.bf16.mxu1 %v4608_v58  ;;  %v4831_v58 = vld [vmem:[#allocation9 + $0x20] ss:$16 sps:$4 sm:$0xff]   ;;  %1651 = vmatprep.subr.bf16.mxu0 %v4829_v57 }
 0x2b6   :  { %1652 = vmatpush1.bf16.msra.mxu0 %v4831_v58 }
 0x2b7   :  { %1695 = vmatpush1.bf16.msra.mxu1 %v4613_v59  ;;  %v4835_v59 = vld [vmem:[#allocation9 + $0x44] ss:$16 sps:$4 sm:$0xff]  }
 0x2b8   :  { %1696 = vmatprep.subr.bf16.mxu1 %v4616_v60  ;;  %v4837_v60 = vld [vmem:[#allocation9 + $0x40] ss:$16 sps:$4 sm:$0xff]   ;;  %1653 = vmatprep.subr.bf16.mxu0 %v4835_v59 }
 0x2ba   :  { %1654 = vmatpush1.bf16.msra.mxu0 %v4837_v60 }
 0x2bb   :  { %1697 = vmatpush1.bf16.msra.mxu1 %v4622_v61  ;;  %v4841_v61 = vld [vmem:[#allocation9 + $0x64] ss:$16 sps:$4 sm:$0xff]  }
 0x2bc   :  { %1698 = vmatprep.subr.bf16.mxu1 %v4625_v62  ;;  %v4843_v62 = vld [vmem:[#allocation9 + $0x60] ss:$16 sps:$4 sm:$0xff]   ;;  %1655 = vmatprep.subr.bf16.mxu0 %v4841_v61 }
 0x2be   :  { %1656 = vmatpush1.bf16.msra.mxu0 %v4843_v62 }
 0x2bf   :  { %1699 = vmatpush1.bf16.msra.mxu1 %v4628_v63  ;;  %v4847_v63 = vld [vmem:[#allocation9 + $0x84] ss:$16 sps:$4 sm:$0xff]  }
 0x2c0   :  { %1700 = vmatprep.subr.bf16.mxu1 %v4631_v1  ;;  %v4849_v1 = vld [vmem:[#allocation9 + $0x80] ss:$16 sps:$4 sm:$0xff]   ;;  %1657 = vmatprep.subr.bf16.mxu0 %v4847_v63 }
 0x2c2   :  { %1658 = vmatpush1.bf16.msra.mxu0 %v4849_v1 }
 0x2c3   :  { %1701 = vmatpush1.bf16.msra.mxu1 %v4634_v2  ;;  %v4852_v2 = vld [vmem:[#allocation9 + $0xa4] ss:$16 sps:$4 sm:$0xff]  }
 0x2c4   :  { %1702 = vmatprep.subr.bf16.mxu1 %v4637_v3  ;;  %v4855_v3 = vld [vmem:[#allocation9 + $0xa0] ss:$16 sps:$4 sm:$0xff]   ;;  %1659 = vmatprep.subr.bf16.mxu0 %v4852_v2 }
 0x2c6   :  { %1660 = vmatpush1.bf16.msra.mxu0 %v4855_v3 }
 0x2c7   :  { %1703 = vmatpush1.bf16.msra.mxu1 %v4640_v4  ;;  %v4858_v4 = vld [vmem:[#allocation9 + $0xc4] ss:$16 sps:$4 sm:$0xff]  }
 0x2c8   :  { %1704 = vmatprep.subr.bf16.mxu1 %v4643_v5  ;;  %v4861_v5 = vld [vmem:[#allocation9 + $0xc0] ss:$16 sps:$4 sm:$0xff]   ;;  %1661 = vmatprep.subr.bf16.mxu0 %v4858_v4 }
 0x2ca   :  { %1662 = vmatpush1.bf16.msra.mxu0 %v4861_v5 }
 0x2cb   :  { %1705 = vmatpush1.bf16.msra.mxu1 %v4646_v6  ;;  %v4864_v6 = vld [vmem:[#allocation9 + $0xe4] ss:$16 sps:$4 sm:$0xff]  }
 0x2cc   :  { %1663 = vmatprep.subr.bf16.mxu0 %v4864_v6 }
 0x2ce   :  { %1664 = vmatpush1.bf16.msra.mxu0 %v4867_v7 }
 0x2cf   :  { %1957 = vmatprep.subr.bf16.mxu0 %v4823_v55 }
 0x381   :  { %v1375_v35 = vpop.f32.mrb[24].mxu0  ;;  %v1416_v38 = vpop.f32.mrb[32].mxu1 }
 0x382   :  { %v1423_v39 = vadd.f32 %v1375_v35, %v376_v29  ;;  %v1425_v42 = vadd.f32 %v1416_v38, %v457_v34  ;;  %v1377_v43 = vpop.f32.mrb[25].mxu0  ;;  %v1418_v45 = vpop.f32.mrb[33].mxu1  ;;  %v4918_v34 = vld [vmem:[#allocation9 + $0x4c] ss:$16 sps:$4 sm:$0xff]   ;;  %v4920_v29 = vld [vmem:[#allocation9 + $0x48] ss:$16 sps:$4 sm:$0xff]  }
 0x383   :  { %v1424_v46 = vadd.f32 %v1377_v43, %v378_v32  ;;  %v1426_v47 = vadd.f32 %v1418_v45, %v459_v30  ;;  %v1379_v48 = vpop.f32.mrb[26].mxu0  ;;  %v1420_v50 = vpop.f32.mrb[34].mxu1  ;;  %v4924_v30 = vld [vmem:[#allocation9 + $0x6c] ss:$16 sps:$4 sm:$0xff]   ;;  %v4926_v32 = vld [vmem:[#allocation9 + $0x68] ss:$16 sps:$4 sm:$0xff]  }
 0x384   :  { %v3679_v11 = vmul.f32 -1.442695, %v1423_v39  ;;  %v1380_v51 = vpop.f32.mrb[27].mxu0  ;;  %v1421_v52 = vpop.f32.mrb[35].mxu1  ;;  %v4930_v35 = vld [vmem:[#allocation9 + $0x8c] ss:$16 sps:$4 sm:$0xff]   ;;  %v461_v48 = vadd.f32 %v4677_v13, %v4744_v20  ;;  %v380_v50 = vadd.f32 %v4701_v28, %v4722_v54 }
 0x385   :  { %v3680_v24 = vmul.f32 -1.442695, %v1424_v46  ;;  %v3681_v12 = vmul.f32 -1.442695, %v1426_v47  ;;  %v4932_v38 = vld [vmem:[#allocation9 + $0x88] ss:$16 sps:$4 sm:$0xff]  }
 0x386   :  { %4185 = vpow2.f32 %v3679_v11  ;;  %v4935_v39 = vld [vmem:[#allocation9 + $0xac] ss:$16 sps:$4 sm:$0xff]   ;;  %v4944_v45 = vld [vmem:[#allocation9 + $0xc8] ss:$16 sps:$4 sm:$0xff]   ;;  %v5249_v11 = vld [vmem:[#allocation17_spill] sm:$0xff] }
 0x387   :  { %4187 = vpow2.f32 %v3680_v24  ;;  %v4941_v43 = vld [vmem:[#allocation9 + $0xcc] ss:$16 sps:$4 sm:$0xff]   ;;  %v4950_v47 = vld [vmem:[#allocation9 + $0xe8] ss:$16 sps:$4 sm:$0xff]   ;;  %v463_v51 = vadd.f32 %v5249_v11, %v4746_v22  ;;  %v5250_v52 = vld [vmem:[#allocation25_spill] sm:$0xff] }
 0x388   :  { %4189 = vpow2.f32 %v3681_v12  ;;  %v4947_v46 = vld [vmem:[#allocation9 + $0xec] ss:$16 sps:$4 sm:$0xff]   ;;  %v382_v24 = vadd.f32 %v5250_v52, %v4728_v0 }
 0x389   :  { %4191 = vtanh.f32 %v1425_v42  ;;  %v4938_v42 = vld [vmem:[#allocation9 + $0xa8] ss:$16 sps:$4 sm:$0xff]  }
 0x390   :  { %v4186_v53 = vpop.eup %4185 }
 0x391   :  { %v4188_v9 = vpop.eup %4187  ;;  %v1430_v26 = vadd.f32 1.0, %v4186_v53 }
 0x392   :  { %v1436_v18 = vadd.f32 1.0, %v4188_v9  ;;  %v4190_v10 = vpop.eup %4189 }
 0x393   :  { %4193 = vrcp.f32 %v1430_v26  ;;  %v4192_v19 = vpop.eup %4191  ;;  %v1443_v33 = vadd.f32 1.0, %v4190_v10 }
 0x394   :  { %4195 = vrcp.f32 %v1436_v18 }
 0x395   :  { %4197 = vrcp.f32 %v1443_v33 }
 0x39d   :  { %v4194_v40 = vpop.eup %4193 }
 0x39e   :  { %v4196_v21 = vpop.eup %4195  ;;  %v1447_v41 = vmul.f32 %v4194_v40, %v4192_v19 }
 0x39f   :  { %v1446_v36 = vmul.f32 %v4196_v21, %v4799_v25  ;;  %v4198_v23 = vpop.eup %4197  ;;  %v4906_v25 = vld [vmem:[#allocation9 + $0xc] ss:$16 sps:$4 sm:$0xff]  }
 0x3a0   :  { %1998 = vmatprep.subr.bf16.mxu1 %v4906_v25 }
 0x3a1   :  { %v4881_v49 = vadd.f32 %v1447_v41, %v1446_v36 }
 0x3a3   :  { %4199 = vtanh.f32 %v4881_v49 }
 0x3ad   :  { %v4200_v15 = vpop.eup %4199 }
 0x3ae   :  { %v4884_v44 = vmul.f32 %v4200_v15, %v4198_v23 }
 0x3b0   :  { %v1456_v17 = vpack.c.bf16 %v4884_v44, %v4884_v44 }
 0x3b2   :  { %1682 = vmatmul.mubr.bf16.vlgmr.msra.gmra.mrb[28].mxu0 %v1456_v17  ;;  %1723 = vmatmul.mubr.bf16.vlgmr.msra.gmra.mrb[36].mxu1 %v1456_v17 }
 0x3b3   :  { %1958 = vmatpush1.bf16.msra.mxu0 %v4825_v56  ;;  %1989 = vmatprep.mubr.bf16.mxu0 %v5248_v16 }
 0x3b4   :  { %1959 = vmatprep.subr.bf16.mxu0 %v4829_v57  ;;  %2030 = vmatprep.mubr.bf16.mxu1 %v5248_v16 }
 0x3b5   :  { %1999 = vmatpush1.bf16.msra.mxu1 %v4908_v14 }
 0x3b6   :  { %2000 = vmatprep.subr.bf16.mxu1 %v4912_v8 }
 0x3b7   :  { %1960 = vmatpush1.bf16.msra.mxu0 %v4831_v58 }
 0x3b8   :  { %1961 = vmatprep.subr.bf16.mxu0 %v4835_v59 }
 0x3b9   :  { %2001 = vmatpush1.bf16.msra.mxu1 %v4914_v27 }
 0x3ba   :  { %2002 = vmatprep.subr.bf16.mxu1 %v4918_v34 }
 0x3bb   :  { %1962 = vmatpush1.bf16.msra.mxu0 %v4837_v60 }
 0x3bc   :  { %1963 = vmatprep.subr.bf16.mxu0 %v4841_v61 }
 0x3bd   :  { %2003 = vmatpush1.bf16.msra.mxu1 %v4920_v29 }
 0x3be   :  { %2004 = vmatprep.subr.bf16.mxu1 %v4924_v30 }
 0x3bf   :  { %1964 = vmatpush1.bf16.msra.mxu0 %v4843_v62 }
 0x3c0   :  { %1965 = vmatprep.subr.bf16.mxu0 %v4847_v63 }
 0x3c1   :  { %2005 = vmatpush1.bf16.msra.mxu1 %v4926_v32 }
 0x3c2   :  { %2006 = vmatprep.subr.bf16.mxu1 %v4930_v35 }
 0x3c3   :  { %1966 = vmatpush1.bf16.msra.mxu0 %v4849_v1 }
 0x3c4   :  { %1967 = vmatprep.subr.bf16.mxu0 %v4852_v2 }
 0x3c5   :  { %2007 = vmatpush1.bf16.msra.mxu1 %v4932_v38 }
 0x3c6   :  { %2008 = vmatprep.subr.bf16.mxu1 %v4935_v39 }
 0x3c7   :  { %1968 = vmatpush1.bf16.msra.mxu0 %v4855_v3 }
 0x3c8   :  { %1969 = vmatprep.subr.bf16.mxu0 %v4858_v4 }
 0x3c9   :  { %2009 = vmatpush1.bf16.msra.mxu1 %v4938_v42 }
 0x3ca   :  { %2010 = vmatprep.subr.bf16.mxu1 %v4941_v43 }
 0x3cb   :  { %1970 = vmatpush1.bf16.msra.mxu0 %v4861_v5 }
 0x3cc   :  { %1971 = vmatprep.subr.bf16.mxu0 %v4864_v6 }
 0x3cd   :  { %2011 = vmatpush1.bf16.msra.mxu1 %v4944_v45 }
 0x3ce   :  { %2012 = vmatprep.subr.bf16.mxu1 %v4947_v46 }
 0x3cf   :  { %1972 = vmatpush1.bf16.msra.mxu0 %v4867_v7 }
 0x3d0   :  { %2265 = vmatprep.subr.bf16.mxu0 %v4823_v55 }
 0x3d1   :  { %2013 = vmatpush1.bf16.msra.mxu1 %v4950_v47 }
 0x3d2   :  { %2306 = vmatprep.subr.bf16.mxu1 %v4906_v25 }
 0x485   :  { %v1683_v12 = vpop.f32.mrb[28].mxu0  ;;  %v1724_v53 = vpop.f32.mrb[36].mxu1 }
 0x486   :  { %v1731_v9 = vadd.f32 %v1683_v12, %v380_v50  ;;  %v1733_v26 = vadd.f32 %v1724_v53, %v461_v48  ;;  %v1685_v18 = vpop.f32.mrb[29].mxu0  ;;  %v1726_v10 = vpop.f32.mrb[37].mxu1 }
 0x487   :  { %v1732_v19 = vadd.f32 %v1685_v18, %v382_v24  ;;  %v1734_v40 = vadd.f32 %v1726_v10, %v463_v51  ;;  %v1687_v21 = vpop.f32.mrb[30].mxu0  ;;  %v1728_v41 = vpop.f32.mrb[38].mxu1 }
 0x488   :  { %v3714_v13 = vmul.f32 -1.442695, %v1731_v9  ;;  %v1688_v33 = vpop.f32.mrb[31].mxu0  ;;  %v1729_v36 = vpop.f32.mrb[39].mxu1  ;;  %v5252_v41 = vld [vmem:[#allocation28_spill] sm:$0xff] }
 0x489   :  { %v3715_v28 = vmul.f32 -1.442695, %v1732_v19  ;;  %v3716_v23 = vmul.f32 -1.442695, %v1734_v40  ;;  %v5253_v33 = vld [vmem:[#allocation19_spill] sm:$0xff] }
 0x48a   :  { %4201 = vpow2.f32 %v3714_v13  ;;  %v386_v13 = vadd.f32 %v5252_v41, %v4722_v54  ;;  %v469_v36 = vadd.f32 %v5253_v33, %v4746_v22 }
 0x48b   :  { %4203 = vpow2.f32 %v3715_v28  ;;  %v5254_v28 = vld [vmem:[#allocation29_spill] sm:$0xff] }
 0x48c   :  { %4205 = vpow2.f32 %v3716_v23  ;;  %v388_v23 = vadd.f32 %v5254_v28, %v4728_v0 }
 0x48d   :  { %4207 = vtanh.f32 %v1733_v26 }
 0x494   :  { %v4202_v15 = vpop.eup %4201 }
 0x495   :  { %v4204_v17 = vpop.eup %4203  ;;  %v1738_v11 = vadd.f32 1.0, %v4202_v15 }
 0x496   :  { %v1744_v50 = vadd.f32 1.0, %v4204_v17  ;;  %v4206_v48 = vpop.eup %4205 }
 0x497   :  { %4209 = vrcp.f32 %v1738_v11  ;;  %v4208_v52 = vpop.eup %4207  ;;  %v1751_v53 = vadd.f32 1.0, %v4206_v48 }
 0x498   :  { %4211 = vrcp.f32 %v1744_v50 }
 0x499   :  { %4213 = vrcp.f32 %v1751_v53 }
 0x4a1   :  { %v4210_v51 = vpop.eup %4209 }
 0x4a2   :  { %v4212_v24 = vpop.eup %4211  ;;  %v1755_v12 = vmul.f32 %v4210_v51, %v4208_v52 }
 0x4a3   :  { %v1754_v9 = vmul.f32 %v4212_v24, %v4881_v49  ;;  %v4214_v10 = vpop.eup %4213  ;;  %v5251_v49 = vld [vmem:[#allocation18_spill] sm:$0xff] }
 0x4a4   :  { %v467_v21 = vadd.f32 %v5251_v49, %v4744_v20 }
 0x4a5   :  { %v4964_v18 = vadd.f32 %v1755_v12, %v1754_v9 }
 0x4a7   :  { %4215 = vtanh.f32 %v4964_v18 }
 0x4b1   :  { %v4216_v19 = vpop.eup %4215 }
 0x4b2   :  { %v4967_v40 = vmul.f32 %v4216_v19, %v4214_v10 }
 0x4b4   :  { %v1764_v26 = vpack.c.bf16 %v4967_v40, %v4967_v40 }
 0x4b6   :  { %1990 = vmatmul.mubr.bf16.vlgmr.msra.gmra.mrb[32].mxu0 %v1764_v26  ;;  %2031 = vmatmul.mubr.bf16.vlgmr.msra.gmra.mrb[40].mxu1 %v1764_v26 }
 0x4b7   :  { %2266 = vmatpush1.bf16.msra.mxu0 %v4825_v56  ;;  %2307 = vmatpush1.bf16.msra.mxu1 %v4908_v14 }
 0x4b8   :  { %2267 = vmatprep.subr.bf16.mxu0 %v4829_v57  ;;  %2308 = vmatprep.subr.bf16.mxu1 %v4912_v8 }
 0x4b9   :  { %2297 = vmatprep.mubr.bf16.mxu0 %v5248_v16  ;;  %2338 = vmatprep.mubr.bf16.mxu1 %v5248_v16 }
 0x4bb   :  { %2268 = vmatpush1.bf16.msra.mxu0 %v4831_v58  ;;  %2309 = vmatpush1.bf16.msra.mxu1 %v4914_v27 }
 0x4bc   :  { %2269 = vmatprep.subr.bf16.mxu0 %v4835_v59  ;;  %2310 = vmatprep.subr.bf16.mxu1 %v4918_v34 }
 0x4bf   :  { %2270 = vmatpush1.bf16.msra.mxu0 %v4837_v60  ;;  %2311 = vmatpush1.bf16.msra.mxu1 %v4920_v29 }
 0x4c0   :  { %2271 = vmatprep.subr.bf16.mxu0 %v4841_v61  ;;  %2312 = vmatprep.subr.bf16.mxu1 %v4924_v30 }
 0x4c3   :  { %2272 = vmatpush1.bf16.msra.mxu0 %v4843_v62  ;;  %2313 = vmatpush1.bf16.msra.mxu1 %v4926_v32 }
 0x4c4   :  { %2273 = vmatprep.subr.bf16.mxu0 %v4847_v63  ;;  %2314 = vmatprep.subr.bf16.mxu1 %v4930_v35 }
 0x4c7   :  { %2274 = vmatpush1.bf16.msra.mxu0 %v4849_v1  ;;  %2315 = vmatpush1.bf16.msra.mxu1 %v4932_v38 }
 0x4c8   :  { %2275 = vmatprep.subr.bf16.mxu0 %v4852_v2  ;;  %2316 = vmatprep.subr.bf16.mxu1 %v4935_v39 }
 0x4cb   :  { %2276 = vmatpush1.bf16.msra.mxu0 %v4855_v3  ;;  %2317 = vmatpush1.bf16.msra.mxu1 %v4938_v42 }
 0x4cc   :  { %2277 = vmatprep.subr.bf16.mxu0 %v4858_v4  ;;  %2318 = vmatprep.subr.bf16.mxu1 %v4941_v43 }
 0x4cf   :  { %2278 = vmatpush1.bf16.msra.mxu0 %v4861_v5  ;;  %2319 = vmatpush1.bf16.msra.mxu1 %v4944_v45 }
 0x4d0   :  { %2279 = vmatprep.subr.bf16.mxu0 %v4864_v6  ;;  %2320 = vmatprep.subr.bf16.mxu1 %v4947_v46 }
 0x4d3   :  { %2280 = vmatpush1.bf16.msra.mxu0 %v4867_v7  ;;  %2321 = vmatpush1.bf16.msra.mxu1 %v4950_v47 }
 0x4d4   :  { %2573 = vmatprep.subr.bf16.mxu0 %v4823_v55  ;;  %2614 = vmatprep.subr.bf16.mxu1 %v4906_v25 }
 0x589   :  { %v1991_v15 = vpop.f32.mrb[32].mxu0  ;;  %v2032_v17 = vpop.f32.mrb[40].mxu1 }
 0x58a   :  { %v2039_v11 = vadd.f32 %v1991_v15, %v386_v13  ;;  %v2041_v50 = vadd.f32 %v2032_v17, %v467_v21  ;;  %v1993_v48 = vpop.f32.mrb[33].mxu0  ;;  %v2034_v55 = vpop.f32.mrb[41].mxu1 }
 0x58b   :  { %v2040_v52 = vadd.f32 %v1993_v48, %v388_v23  ;;  %v2042_v51 = vadd.f32 %v2034_v55, %v469_v36  ;;  %v1995_v24 = vpop.f32.mrb[34].mxu0  ;;  %v2036_v12 = vpop.f32.mrb[42].mxu1 }
 0x58c   :  { %v3749_v53 = vmul.f32 -1.442695, %v2039_v11  ;;  %v1996_v9 = vpop.f32.mrb[35].mxu0  ;;  %v2037_v10 = vpop.f32.mrb[43].mxu1 }
 0x58d   :  { %v3750_v19 = vmul.f32 -1.442695, %v2040_v52  ;;  %v3751_v26 = vmul.f32 -1.442695, %v2042_v51 }
 0x58e   :  { %4217 = vpow2.f32 %v3749_v53 }
 0x58f   :  { %4219 = vpow2.f32 %v3750_v19 }
 0x590   :  { %4221 = vpow2.f32 %v3751_v26 }
 0x591   :  { %4223 = vtanh.f32 %v2041_v50 }
 0x598   :  { %v4218_v49 = vpop.eup %4217 }
 0x599   :  { %v4220_v41 = vpop.eup %4219  ;;  %v2046_v33 = vadd.f32 1.0, %v4218_v49 }
 0x59a   :  { %v2052_v13 = vadd.f32 1.0, %v4220_v41  ;;  %v4222_v21 = vpop.eup %4221 }
 0x59b   :  { %4225 = vrcp.f32 %v2046_v33  ;;  %v4224_v28 = vpop.eup %4223  ;;  %v2059_v17 = vadd.f32 1.0, %v4222_v21 }
 0x59c   :  { %4227 = vrcp.f32 %v2052_v13 }
 0x59d   :  { %4229 = vrcp.f32 %v2059_v17 }
 0x5a5   :  { %v4226_v36 = vpop.eup %4225 }
 0x5a6   :  { %v4228_v23 = vpop.eup %4227  ;;  %v2063_v15 = vmul.f32 %v4226_v36, %v4224_v28 }
 0x5a7   :  { %v2062_v11 = vmul.f32 %v4228_v23, %v4964_v18  ;;  %v4230_v55 = vpop.eup %4229 }
 0x5a9   :  { %v5014_v48 = vadd.f32 %v2063_v15, %v2062_v11 }
 0x5ab   :  { %4231 = vtanh.f32 %v5014_v48 }
 0x5b5   :  { %v4232_v52 = vpop.eup %4231 }
 0x5b6   :  { %v5017_v51 = vmul.f32 %v4232_v52, %v4230_v55 }
 0x5b8   :  { %v2072_v50 = vpack.c.bf16 %v5017_v51, %v5017_v51 }
 0x5ba   :  { %2298 = vmatmul.mubr.bf16.vlgmr.msra.gmra.mrb[36].mxu0 %v2072_v50  ;;  %2339 = vmatmul.mubr.bf16.vlgmr.msra.gmra.mrb[44].mxu1 %v2072_v50 }
 0x5bb   :  { %2574 = vmatpush1.bf16.msra.mxu0 %v4825_v56  ;;  %2615 = vmatpush1.bf16.msra.mxu1 %v4908_v14  ;;  %v5255_v56 = vld [vmem:[#allocation20_spill] sm:$0xff] }
 0x5bc   :  { %2575 = vmatprep.subr.bf16.mxu0 %v4829_v57  ;;  %2616 = vmatprep.subr.bf16.mxu1 %v4912_v8  ;;  %v471_v57 = vadd.f32 %v5255_v56, %v4744_v20 }
 0x5bd   :  { %2605 = vmatprep.mubr.bf16.mxu0 %v5248_v16  ;;  %2646 = vmatprep.mubr.bf16.mxu1 %v5248_v16 }
 0x5bf   :  { %2576 = vmatpush1.bf16.msra.mxu0 %v4831_v58  ;;  %2617 = vmatpush1.bf16.msra.mxu1 %v4914_v27  ;;  %v5256_v58 = vld [vmem:[#allocation30_spill] sm:$0xff] }
 0x5c0   :  { %2577 = vmatprep.subr.bf16.mxu0 %v4835_v59  ;;  %2618 = vmatprep.subr.bf16.mxu1 %v4918_v34  ;;  %v390_v59 = vadd.f32 %v5256_v58, %v4722_v54 }
 0x5c3   :  { %2578 = vmatpush1.bf16.msra.mxu0 %v4837_v60  ;;  %2619 = vmatpush1.bf16.msra.mxu1 %v4920_v29  ;;  %v5257_v60 = vld [vmem:[#allocation21_spill] sm:$0xff] }
 0x5c4   :  { %2579 = vmatprep.subr.bf16.mxu0 %v4841_v61  ;;  %2620 = vmatprep.subr.bf16.mxu1 %v4924_v30  ;;  %v473_v61 = vadd.f32 %v5257_v60, %v4746_v22 }
 0x5c7   :  { %2580 = vmatpush1.bf16.msra.mxu0 %v4843_v62  ;;  %2621 = vmatpush1.bf16.msra.mxu1 %v4926_v32  ;;  %v5258_v62 = vld [vmem:[#allocation31_spill] sm:$0xff] }
 0x5c8   :  { %2581 = vmatprep.subr.bf16.mxu0 %v4847_v63  ;;  %2622 = vmatprep.subr.bf16.mxu1 %v4930_v35  ;;  %v392_v63 = vadd.f32 %v5258_v62, %v4728_v0 }
 0x5cb   :  { %2582 = vmatpush1.bf16.msra.mxu0 %v4849_v1  ;;  %2623 = vmatpush1.bf16.msra.mxu1 %v4932_v38 }
 0x5cc   :  { %2583 = vmatprep.subr.bf16.mxu0 %v4852_v2  ;;  %2624 = vmatprep.subr.bf16.mxu1 %v4935_v39 }
 0x5cf   :  { %2584 = vmatpush1.bf16.msra.mxu0 %v4855_v3  ;;  %2625 = vmatpush1.bf16.msra.mxu1 %v4938_v42 }
 0x5d0   :  { %2585 = vmatprep.subr.bf16.mxu0 %v4858_v4  ;;  %2626 = vmatprep.subr.bf16.mxu1 %v4941_v43 }
 0x5d3   :  { %2586 = vmatpush1.bf16.msra.mxu0 %v4861_v5  ;;  %2627 = vmatpush1.bf16.msra.mxu1 %v4944_v45 }
 0x5d4   :  { %2587 = vmatprep.subr.bf16.mxu0 %v4864_v6  ;;  %2628 = vmatprep.subr.bf16.mxu1 %v4947_v46 }
 0x5d7   :  { %2588 = vmatpush1.bf16.msra.mxu0 %v4867_v7  ;;  %2629 = vmatpush1.bf16.msra.mxu1 %v4950_v47 }
 0x5d8   :  { %2922 = vmatprep.subr.bf16.mxu1 %v4906_v25 }
 0x68d   :  { %v2299_v1 = vpop.f32.mrb[36].mxu0  ;;  %v2340_v2 = vpop.f32.mrb[44].mxu1 }
 0x68e   :  { %v2347_v3 = vadd.f32 %v2299_v1, %v390_v59  ;;  %v2349_v4 = vadd.f32 %v2340_v2, %v471_v57  ;;  %v2301_v5 = vpop.f32.mrb[37].mxu0  ;;  %v2342_v6 = vpop.f32.mrb[45].mxu1  ;;  %v5259_v57 = vld [vmem:[#allocation22_spill] sm:$0xff]  ;;  %v5260_v59 = vld [vmem:[#allocation32_spill] sm:$0xff] }
 0x68f   :  { %v2348_v7 = vadd.f32 %v2301_v5, %v392_v63  ;;  %v2350_v25 = vadd.f32 %v2342_v6, %v473_v61  ;;  %v2303_v18 = vpop.f32.mrb[38].mxu0  ;;  %v2344_v24 = vpop.f32.mrb[46].mxu1  ;;  %v477_v58 = vadd.f32 %v5259_v57, %v4744_v20  ;;  %v396_v60 = vadd.f32 %v5260_v59, %v4722_v54  ;;  %v5261_v61 = vld [vmem:[#allocation23_spill] sm:$0xff]  ;;  %v5262_v63 = vld [vmem:[#allocation33_spill] sm:$0xff]  ;;  %v4126_v59 = vld [vmem:[#allocation9 + $0xe8] ss:$16 sps:$4 sm:$0xff]  }
 0x690   :  { %v3784_v12 = vmul.f32 -1.442695, %v2347_v3  ;;  %v2304_v53 = vpop.f32.mrb[39].mxu0  ;;  %v2345_v9 = vpop.f32.mrb[47].mxu1  ;;  %v479_v62 = vadd.f32 %v5261_v61, %v4746_v22  ;;  %v398_v1 = vadd.f32 %v5262_v63, %v4728_v0 }
 0x691   :  { %v3785_v10 = vmul.f32 -1.442695, %v2348_v7  ;;  %v3786_v19 = vmul.f32 -1.442695, %v2350_v25 }
 0x692   :  { %4233 = vpow2.f32 %v3784_v12 }
 0x693   :  { %4235 = vpow2.f32 %v3785_v10 }
 0x694   :  { %4237 = vpow2.f32 %v3786_v19 }
 0x695   :  { %4239 = vtanh.f32 %v2349_v4 }
 0x69c   :  { %v4234_v26 = vpop.eup %4233 }
 0x69d   :  { %v4236_v49 = vpop.eup %4235  ;;  %v2354_v41 = vadd.f32 1.0, %v4234_v26 }
 0x69e   :  { %v2360_v33 = vadd.f32 1.0, %v4236_v49  ;;  %v4238_v13 = vpop.eup %4237 }
 0x69f   :  { %4241 = vrcp.f32 %v2354_v41  ;;  %v4240_v21 = vpop.eup %4239  ;;  %v2367_v15 = vadd.f32 1.0, %v4238_v13 }
 0x6a0   :  { %4243 = vrcp.f32 %v2360_v33 }
 0x6a1   :  { %4245 = vrcp.f32 %v2367_v15 }
 0x6a9   :  { %v4242_v28 = vpop.eup %4241 }
 0x6aa   :  { %v4244_v36 = vpop.eup %4243  ;;  %v2371_v23 = vmul.f32 %v4242_v28, %v4240_v21 }
 0x6ab   :  { %v2370_v17 = vmul.f32 %v4244_v36, %v5014_v48  ;;  %v4246_v55 = vpop.eup %4245  ;;  %v5128_v48 = vld [vmem:[#allocation9 + $0xe0] ss:$16 sps:$4 sm:$0xff]  }
 0x6ad   :  { %v5063_v11 = vadd.f32 %v2371_v23, %v2370_v17 }
 0x6af   :  { %4247 = vtanh.f32 %v5063_v11 }
 0x6b9   :  { %v4248_v52 = vpop.eup %4247 }
 0x6ba   :  { %v5066_v50 = vmul.f32 %v4248_v52, %v4246_v55 }
 0x6bc   :  { %v2380_v56 = vpack.c.bf16 %v5066_v50, %v5066_v50 }
 0x6be   :  { %2606 = vmatmul.mubr.bf16.vlgmr.msra.gmra.mrb[40].mxu0 %v2380_v56  ;;  %2647 = vmatmul.mubr.bf16.vlgmr.msra.gmra.mrb[48].mxu1 %v2380_v56 }
 0x6bf   :  { %2923 = vmatpush1.bf16.msra.mxu1 %v4908_v14  ;;  %2913 = vmatprep.mubr.bf16.mxu0 %v5248_v16  ;;  %v4083_v14 = vld [vmem:[#allocation9 + $0x4] ss:$16 sps:$4 sm:$0xff]  }
 0x6c0   :  { %2924 = vmatprep.subr.bf16.mxu1 %v4912_v8  ;;  %2954 = vmatprep.mubr.bf16.mxu1 %v5248_v16  ;;  %v5087_v8 = vld [vmem:[#allocation9] ss:$16 sps:$4 sm:$0xff]  }
 0x6c1   :  { %2881 = vmatprep.subr.bf16.mxu0 %v4083_v14 }
 0x6c2   :  { %2882 = vmatpush1.bf16.msra.mxu0 %v5087_v8 }
 0x6c3   :  { %2925 = vmatpush1.bf16.msra.mxu1 %v4914_v27  ;;  %v5090_v27 = vld [vmem:[#allocation9 + $0x24] ss:$16 sps:$4 sm:$0xff]  }
 0x6c4   :  { %2926 = vmatprep.subr.bf16.mxu1 %v4918_v34  ;;  %v5092_v34 = vld [vmem:[#allocation9 + $0x20] ss:$16 sps:$4 sm:$0xff]   ;;  %2883 = vmatprep.subr.bf16.mxu0 %v5090_v27 }
 0x6c6   :  { %2884 = vmatpush1.bf16.msra.mxu0 %v5092_v34 }
 0x6c7   :  { %2927 = vmatpush1.bf16.msra.mxu1 %v4920_v29  ;;  %v5096_v29 = vld [vmem:[#allocation9 + $0x44] ss:$16 sps:$4 sm:$0xff]  }
 0x6c8   :  { %2928 = vmatprep.subr.bf16.mxu1 %v4924_v30  ;;  %v5098_v30 = vld [vmem:[#allocation9 + $0x40] ss:$16 sps:$4 sm:$0xff]   ;;  %2885 = vmatprep.subr.bf16.mxu0 %v5096_v29 }
 0x6ca   :  { %2886 = vmatpush1.bf16.msra.mxu0 %v5098_v30 }
 0x6cb   :  { %2929 = vmatpush1.bf16.msra.mxu1 %v4926_v32  ;;  %v5102_v32 = vld [vmem:[#allocation9 + $0x64] ss:$16 sps:$4 sm:$0xff]  }
 0x6cc   :  { %2930 = vmatprep.subr.bf16.mxu1 %v4930_v35  ;;  %v5104_v35 = vld [vmem:[#allocation9 + $0x60] ss:$16 sps:$4 sm:$0xff]   ;;  %2887 = vmatprep.subr.bf16.mxu0 %v5102_v32 }
 0x6ce   :  { %2888 = vmatpush1.bf16.msra.mxu0 %v5104_v35 }
 0x6cf   :  { %2931 = vmatpush1.bf16.msra.mxu1 %v4932_v38  ;;  %v5108_v38 = vld [vmem:[#allocation9 + $0x84] ss:$16 sps:$4 sm:$0xff]  }
 0x6d0   :  { %2932 = vmatprep.subr.bf16.mxu1 %v4935_v39  ;;  %v5110_v39 = vld [vmem:[#allocation9 + $0x80] ss:$16 sps:$4 sm:$0xff]   ;;  %2889 = vmatprep.subr.bf16.mxu0 %v5108_v38 }
 0x6d2   :  { %2890 = vmatpush1.bf16.msra.mxu0 %v5110_v39 }
 0x6d3   :  { %2933 = vmatpush1.bf16.msra.mxu1 %v4938_v42  ;;  %v5113_v42 = vld [vmem:[#allocation9 + $0xa4] ss:$16 sps:$4 sm:$0xff]  }
 0x6d4   :  { %2934 = vmatprep.subr.bf16.mxu1 %v4941_v43  ;;  %v5116_v43 = vld [vmem:[#allocation9 + $0xa0] ss:$16 sps:$4 sm:$0xff]   ;;  %2891 = vmatprep.subr.bf16.mxu0 %v5113_v42 }
 0x6d6   :  { %2892 = vmatpush1.bf16.msra.mxu0 %v5116_v43 }
 0x6d7   :  { %2935 = vmatpush1.bf16.msra.mxu1 %v4944_v45  ;;  %v5119_v45 = vld [vmem:[#allocation9 + $0xc4] ss:$16 sps:$4 sm:$0xff]  }
 0x6d8   :  { %2936 = vmatprep.subr.bf16.mxu1 %v4947_v46  ;;  %v5122_v46 = vld [vmem:[#allocation9 + $0xc0] ss:$16 sps:$4 sm:$0xff]   ;;  %2893 = vmatprep.subr.bf16.mxu0 %v5119_v45 }
 0x6da   :  { %2894 = vmatpush1.bf16.msra.mxu0 %v5122_v46 }
 0x6db   :  { %2937 = vmatpush1.bf16.msra.mxu1 %v4950_v47  ;;  %v5125_v47 = vld [vmem:[#allocation9 + $0xe4] ss:$16 sps:$4 sm:$0xff]  }
 0x6dc   :  { %2895 = vmatprep.subr.bf16.mxu0 %v5125_v47 }
 0x6de   :  { %2896 = vmatpush1.bf16.msra.mxu0 %v5128_v48 }
 0x6df   :  { %3189 = vmatprep.subr.bf16.mxu0 %v4083_v14 }
 0x791   :  { %v2607_v2 = vpop.f32.mrb[40].mxu0  ;;  %v2648_v3 = vpop.f32.mrb[48].mxu1 }
 0x792   :  { %v2655_v4 = vadd.f32 %v2607_v2, %v396_v60  ;;  %v2657_v5 = vadd.f32 %v2648_v3, %v477_v58  ;;  %v2609_v6 = vpop.f32.mrb[41].mxu0  ;;  %v2650_v7 = vpop.f32.mrb[49].mxu1  ;;  %v5263_v60 = vld [vmem:[#allocation24_spill] sm:$0xff]  ;;  %v5266_v3 = vld [vmem:[#allocation35_spill] sm:$0xff] }
 0x793   :  { %v2656_v25 = vadd.f32 %v2609_v6, %v398_v1  ;;  %v2658_v18 = vadd.f32 %v2650_v7, %v479_v62  ;;  %v2611_v24 = vpop.f32.mrb[42].mxu0  ;;  %v2652_v12 = vpop.f32.mrb[50].mxu1  ;;  %v481_v61 = vadd.f32 %v5263_v60, %v4744_v20  ;;  %v5264_v62 = vld [vmem:[#allocation34_spill] sm:$0xff]  ;;  %v5265_v1 = vld [vmem:[#allocation27_spill] sm:$0xff] }
 0x794   :  { %v3819_v53 = vmul.f32 -1.442695, %v2655_v4  ;;  %v2612_v9 = vpop.f32.mrb[43].mxu0  ;;  %v2653_v10 = vpop.f32.mrb[51].mxu1  ;;  %v400_v63 = vadd.f32 %v5264_v62, %v4722_v54  ;;  %v483_v2 = vadd.f32 %v5265_v1, %v4746_v22  ;;  %v402_v4 = vadd.f32 %v5266_v3, %v4728_v0  ;;  %v4152_v60 = vld [vmem:[#allocation10 + $0x74] ss:$8 sps:$4 sm:$0xff]  }
 0x795   :  { %v3820_v19 = vmul.f32 -1.442695, %v2656_v25  ;;  %v3821_v26 = vmul.f32 -1.442695, %v2658_v18  ;;  %v3309_v62 = vpack.c.bf16 %v4802_v31, %v4753_v37  ;;  %v3311_v1 = vpack.c.bf16 %v5066_v50, %v5017_v51 }
 0x796   :  { %4249 = vpow2.f32 %v3819_v53 }
 0x797   :  { %4251 = vpow2.f32 %v3820_v19 }
 0x798   :  { %4253 = vpow2.f32 %v3821_v26 }
 0x799   :  { %4255 = vtanh.f32 %v2657_v5 }
 0x7a0   :  { %v4250_v49 = vpop.eup %4249 }
 0x7a1   :  { %v4252_v41 = vpop.eup %4251  ;;  %v2662_v33 = vadd.f32 1.0, %v4250_v49 }
 0x7a2   :  { %v2668_v13 = vadd.f32 1.0, %v4252_v41  ;;  %v4254_v21 = vpop.eup %4253 }
 0x7a3   :  { %4257 = vrcp.f32 %v2662_v33  ;;  %v4256_v28 = vpop.eup %4255  ;;  %v2675_v17 = vadd.f32 1.0, %v4254_v21 }
 0x7a4   :  { %4259 = vrcp.f32 %v2668_v13 }
 0x7a5   :  { %4261 = vrcp.f32 %v2675_v17 }
 0x7ad   :  { %v4258_v36 = vpop.eup %4257 }
 0x7ae   :  { %v4260_v23 = vpop.eup %4259  ;;  %v2679_v15 = vmul.f32 %v4258_v36, %v4256_v28 }
 0x7af   :  { %v2678_v55 = vmul.f32 %v4260_v23, %v5063_v11  ;;  %v4262_v56 = vpop.eup %4261  ;;  %v4107_v11 = vld [vmem:[#allocation9 + $0xc] ss:$16 sps:$4 sm:$0xff]  }
 0x7b0   :  { %3230 = vmatprep.subr.bf16.mxu1 %v4107_v11 }
 0x7b1   :  { %v5141_v52 = vadd.f32 %v2679_v15, %v2678_v55 }
 0x7b3   :  { %4263 = vtanh.f32 %v5141_v52 }
 0x7bd   :  { %v4264_v14 = vpop.eup %4263 }
 0x7be   :  { %v5144_v57 = vmul.f32 %v4264_v14, %v4262_v56 }
 0x7c0   :  { %v2688_v58 = vpack.c.bf16 %v5144_v57, %v5144_v57 }
 0x7c2   :  { %2914 = vmatmul.mubr.bf16.vlgmr.msra.gmra.mrb[44].mxu0 %v2688_v58  ;;  %2955 = vmatmul.mubr.bf16.vlgmr.msra.gmra.mrb[52].mxu1 %v2688_v58 }
 0x7c3   :  { %3190 = vmatpush1.bf16.msra.mxu0 %v5087_v8  ;;  %3221 = vmatprep.mubr.bf16.mxu0 %v5248_v16  ;;  %v4105_v8 = vld [vmem:[#allocation9 + $0x8] ss:$16 sps:$4 sm:$0xff]  }
 0x7c4   :  { %3191 = vmatprep.subr.bf16.mxu0 %v5090_v27  ;;  %3262 = vmatprep.mubr.bf16.mxu1 %v5248_v16  ;;  %v4110_v27 = vld [vmem:[#allocation9 + $0x2c] ss:$16 sps:$4 sm:$0xff]  }
 0x7c5   :  { %3231 = vmatpush1.bf16.msra.mxu1 %v4105_v8 }
 0x7c6   :  { %3232 = vmatprep.subr.bf16.mxu1 %v4110_v27 }
 0x7c7   :  { %3192 = vmatpush1.bf16.msra.mxu0 %v5092_v34  ;;  %v4108_v34 = vld [vmem:[#allocation9 + $0x28] ss:$16 sps:$4 sm:$0xff]  }
 0x7c8   :  { %3193 = vmatprep.subr.bf16.mxu0 %v5096_v29  ;;  %v4113_v29 = vld [vmem:[#allocation9 + $0x4c] ss:$16 sps:$4 sm:$0xff]  }
 0x7c9   :  { %3233 = vmatpush1.bf16.msra.mxu1 %v4108_v34 }
 0x7ca   :  { %3234 = vmatprep.subr.bf16.mxu1 %v4113_v29  ;;  %v4129_v29 = vld [vmem:[#allocation10] ss:$8 sps:$4 sm:$0xff]  }
 0x7cb   :  { %3194 = vmatpush1.bf16.msra.mxu0 %v5098_v30  ;;  %v4111_v30 = vld [vmem:[#allocation9 + $0x48] ss:$16 sps:$4 sm:$0xff]  }
 0x7cc   :  { %3195 = vmatprep.subr.bf16.mxu0 %v5102_v32  ;;  %v4116_v32 = vld [vmem:[#allocation9 + $0x6c] ss:$16 sps:$4 sm:$0xff]  }
 0x7cd   :  { %3235 = vmatpush1.bf16.msra.mxu1 %v4111_v30 }
 0x7ce   :  { %3236 = vmatprep.subr.bf16.mxu1 %v4116_v32  ;;  %v4134_v32 = vld [vmem:[#allocation10 + $0x14] ss:$8 sps:$4 sm:$0xff]  }
 0x7cf   :  { %3196 = vmatpush1.bf16.msra.mxu0 %v5104_v35  ;;  %v4114_v35 = vld [vmem:[#allocation9 + $0x68] ss:$16 sps:$4 sm:$0xff]  }
 0x7d0   :  { %3197 = vmatprep.subr.bf16.mxu0 %v5108_v38  ;;  %v4119_v38 = vld [vmem:[#allocation9 + $0x8c] ss:$16 sps:$4 sm:$0xff]  }
 0x7d1   :  { %3237 = vmatpush1.bf16.msra.mxu1 %v4114_v35  ;;  %v4132_v35 = vld [vmem:[#allocation10 + $0x10] ss:$8 sps:$4 sm:$0xff]  }
 0x7d2   :  { %3238 = vmatprep.subr.bf16.mxu1 %v4119_v38  ;;  %v4137_v38 = vld [vmem:[#allocation10 + $0x24] ss:$8 sps:$4 sm:$0xff]  }
 0x7d3   :  { %3198 = vmatpush1.bf16.msra.mxu0 %v5110_v39  ;;  %v4117_v39 = vld [vmem:[#allocation9 + $0x88] ss:$16 sps:$4 sm:$0xff]  }
 0x7d4   :  { %3199 = vmatprep.subr.bf16.mxu0 %v5113_v42  ;;  %v4122_v42 = vld [vmem:[#allocation9 + $0xac] ss:$16 sps:$4 sm:$0xff]  }
 0x7d5   :  { %3239 = vmatpush1.bf16.msra.mxu1 %v4117_v39  ;;  %v4140_v39 = vld [vmem:[#allocation10 + $0x34] ss:$8 sps:$4 sm:$0xff]  }
 0x7d6   :  { %3240 = vmatprep.subr.bf16.mxu1 %v4122_v42  ;;  %v4138_v42 = vld [vmem:[#allocation10 + $0x30] ss:$8 sps:$4 sm:$0xff]  }
 0x7d7   :  { %3200 = vmatpush1.bf16.msra.mxu0 %v5116_v43  ;;  %v4120_v43 = vld [vmem:[#allocation9 + $0xa8] ss:$16 sps:$4 sm:$0xff]  }
 0x7d8   :  { %3201 = vmatprep.subr.bf16.mxu0 %v5119_v45  ;;  %v4125_v45 = vld [vmem:[#allocation9 + $0xcc] ss:$16 sps:$4 sm:$0xff]  }
 0x7d9   :  { %3241 = vmatpush1.bf16.msra.mxu1 %v4120_v43  ;;  %v4143_v43 = vld [vmem:[#allocation10 + $0x44] ss:$8 sps:$4 sm:$0xff]  }
 0x7da   :  { %3242 = vmatprep.subr.bf16.mxu1 %v4125_v45  ;;  %v4141_v45 = vld [vmem:[#allocation10 + $0x40] ss:$8 sps:$4 sm:$0xff]  }
 0x7db   :  { %3202 = vmatpush1.bf16.msra.mxu0 %v5122_v46  ;;  %v4131_v46 = vld [vmem:[#allocation10 + $0x4] ss:$8 sps:$4 sm:$0xff]  }
 0x7dc   :  { %3203 = vmatprep.subr.bf16.mxu0 %v5125_v47  ;;  %v4123_v47 = vld [vmem:[#allocation9 + $0xc8] ss:$16 sps:$4 sm:$0xff]  }
 0x7dd   :  { %3243 = vmatpush1.bf16.msra.mxu1 %v4123_v47  ;;  %v4144_v47 = vld [vmem:[#allocation10 + $0x50] ss:$8 sps:$4 sm:$0xff]  }
 0x7df   :  { %3204 = vmatpush1.bf16.msra.mxu0 %v5128_v48  ;;  %v4128_v48 = vld [vmem:[#allocation9 + $0xec] ss:$16 sps:$4 sm:$0xff]  }
 0x7e0   :  { %3422 = vmatprep.subr.bf16.mxu0 %v4131_v46  ;;  %3244 = vmatprep.subr.bf16.mxu1 %v4128_v48  ;;  %v4146_v46 = vld [vmem:[#allocation10 + $0x54] ss:$8 sps:$4 sm:$0xff]   ;;  %v4149_v48 = vld [vmem:[#allocation10 + $0x64] ss:$8 sps:$4 sm:$0xff]  }
 0x7e1   :  { %3245 = vmatpush1.bf16.msra.mxu1 %v4126_v59  ;;  %v4147_v59 = vld [vmem:[#allocation10 + $0x60] ss:$8 sps:$4 sm:$0xff]  }
 0x895   :  { %v2915_v5 = vpop.f32.mrb[44].mxu0  ;;  %v2956_v6 = vpop.f32.mrb[52].mxu1 }
 0x896   :  { %v2963_v7 = vadd.f32 %v2915_v5, %v400_v63  ;;  %v2965_v25 = vadd.f32 %v2956_v6, %v481_v61  ;;  %v2917_v18 = vpop.f32.mrb[45].mxu0  ;;  %v2958_v24 = vpop.f32.mrb[53].mxu1  ;;  %v4150_v61 = vld [vmem:[#allocation10 + $0x70] ss:$8 sps:$4 sm:$0xff]   ;;  %v3310_v63 = vpack.c.bf16 %v4967_v40, %v4884_v44 }
 0x897   :  { %v2964_v12 = vadd.f32 %v2917_v18, %v402_v4  ;;  %v2966_v53 = vadd.f32 %v2958_v24, %v483_v2  ;;  %v2919_v9 = vpop.f32.mrb[46].mxu0  ;;  %v2960_v10 = vpop.f32.mrb[54].mxu1 }
 0x898   :  { %v3854_v19 = vmul.f32 -1.442695, %v2963_v7  ;;  %v2920_v26 = vpop.f32.mrb[47].mxu0  ;;  %v2961_v49 = vpop.f32.mrb[55].mxu1  ;;  %v3330_v9 = vld [vmem:[%s5221_s5] sm:$0x3] }
 0x899   :  { %v3855_v41 = vmul.f32 -1.442695, %v2964_v12  ;;  %v3856_v33 = vmul.f32 -1.442695, %v2966_v53  ;;  %s4426_s5 = smov [#allocation12]  }
 0x89a   :  { %4265 = vpow2.f32 %v3854_v19  ;;  %s3526_s27 = sshll.u32 %s4426_s5, 4  ;;  %s3527_s27 = int_to_ptr.vmem [resolvable:$true] %s3526_s27 }
 0x89b   :  { %4267 = vpow2.f32 %v3855_v41  ;;  %v5267_v41 = vld [vmem:[#allocation26_spill] sm:$0xff]  ;;  %s4385_s28 = scalar_lea.vmem %s3527_s27, 2304  ;;  %p4390_p5 = scmp.lt.s32.totalorder %s3527_s27, %s3527_s27 }
 0x89c   :  { %4269 = vpow2.f32 %v3856_v33  ;;  %p4386_p4 = scmp.ne.s32.totalorder %s3527_s27, %s4385_s28  ;;  %p4391_p6 = scmp.lt.s32.totalorder %s4385_s28, %s4385_s28 }
 0x89d   :  { %4271 = vtanh.f32 %v2965_v25 }
 0x89e   :  { %p4392_p7 = por %p4391_p6, %p4390_p5 }
 0x8a0   :  { %p4393_p8 = pnand %p4392_p7, %p4386_p4 }
 0x8a4   :  { %v4266_v13 = vpop.eup %4265 }
 0x8a5   :  { %v4268_v21 = vpop.eup %4267  ;;  %v2970_v28 = vadd.f32 1.0, %v4266_v13 }
 0x8a6   :  { %v2976_v36 = vadd.f32 1.0, %v4268_v21  ;;  %v4270_v23 = vpop.eup %4269  ;;  %v5269_v21 = vsub.s32 1, %v5267_v41 }
 0x8a7   :  { %4273 = vrcp.f32 %v2970_v28  ;;  %v4272_v15 = vpop.eup %4271  ;;  %v2983_v14 = vadd.f32 1.0, %v4270_v23 }
 0x8a8   :  { %4275 = vrcp.f32 %v2976_v36  ;;  %v3339_v28 = vrot.slane %v3330_v9, %v5269_v21 }
 0x8a9   :  { %4277 = vrcp.f32 %v2983_v14 }
 0x8b1   :  { %v4274_v17 = vpop.eup %4273 }
 0x8b2   :  { %v4276_v55 = vpop.eup %4275  ;;  %v2987_v56 = vmul.f32 %v4274_v17, %v4272_v15 }
 0x8b3   :  { %v2986_v58 = vmul.f32 %v4276_v55, %v5141_v52  ;;  %v4278_v8 = vpop.eup %4277  ;;  %v4135_v52 = vld [vmem:[#allocation10 + $0x20] ss:$8 sps:$4 sm:$0xff]  }
 0x8b5   :  { %v5174_v11 = vadd.f32 %v2987_v56, %v2986_v58 }
 0x8b7   :  { %4279 = vtanh.f32 %v5174_v11 }
 0x8c1   :  { %v4280_v27 = vpop.eup %4279 }
 0x8c2   :  { %v2990_v34 = vmul.f32 %v4280_v27, %v4278_v8 }
 0x8c4   :  { %v2996_v30 = vpack.c.bf16 %v2990_v34, %v2990_v34  ;;  %v3312_v2 = vpack.c.bf16 %v2990_v34, %v5144_v57 }
 0x8c6   :  { %3222 = vmatmul.mubr.bf16.vlgmr.msra.gmra.mrb[16].mxu0 %v2996_v30  ;;  %3263 = vmatmul.mubr.bf16.vlgmr.msra.gmra.mrb[16].mxu1 %v2996_v30 }
 0x8c7   :  { %3423 = vmatpush1.bf16.msra.mxu0 %v4129_v29  ;;  %3454 = vmatprep.mubr.bf16.mxu0 %v5248_v16 }
 0x8c8   :  { %3424 = vmatprep.subr.bf16.mxu0 %v4134_v32 }
 0x8cb   :  { %3425 = vmatpush1.bf16.msra.mxu0 %v4132_v35 }
 0x8cc   :  { %3426 = vmatprep.subr.bf16.mxu0 %v4137_v38 }
 0x8cf   :  { %3427 = vmatpush1.bf16.msra.mxu0 %v4135_v52 }
 0x8d0   :  { %3428 = vmatprep.subr.bf16.mxu0 %v4140_v39 }
 0x8d3   :  { %3429 = vmatpush1.bf16.msra.mxu0 %v4138_v42 }
 0x8d4   :  { %3430 = vmatprep.subr.bf16.mxu0 %v4143_v43 }
 0x8d7   :  { %3431 = vmatpush1.bf16.msra.mxu0 %v4141_v45 }
 0x8d8   :  { %3432 = vmatprep.subr.bf16.mxu0 %v4146_v46 }
 0x8db   :  { %3433 = vmatpush1.bf16.msra.mxu0 %v4144_v47 }
 0x8dc   :  { %3434 = vmatprep.subr.bf16.mxu0 %v4149_v48 }
 0x8df   :  { %3435 = vmatpush1.bf16.msra.mxu0 %v4147_v59 }
 0x8e0   :  { %3436 = vmatprep.subr.bf16.mxu0 %v4152_v60 }
 0x8e3   :  { %3437 = vmatpush1.bf16.msra.mxu0 %v4150_v61 }
 0x8e6   :  { %3455 = vmatmul.mubr.bf16.vlgmr.msra.gmra.mrb[48].mxu0 %v3309_v62 }
 0x8e7   :  { %3464 = vmatprep.mubr.bf16.mxu0 %v5248_v16 }
 0x8ee   :  { %3465 = vmatmul.mubr.bf16.gmra.mrb[52].mxu0 %v3310_v63 }
 0x8ef   :  { %3474 = vmatprep.mubr.bf16.mxu0 %v5248_v16 }
 0x8f6   :  { %3475 = vmatmul.mubr.bf16.gmra.mrb[56].mxu0 %v3311_v1 }
 0x8f7   :  { %3484 = vmatprep.mubr.bf16.mxu0 %v5248_v16 }
 0x8fe   :  { %3485 = vmatmul.mubr.bf16.gmra.mrb[60].mxu0 %v3312_v2 }
 0x8ff   :  { %3494 = vmatprep.mubr.bf16.mxu0 %v5248_v16 }
 0x999   :  { %v3223_v37 = vpop.f32.mrb[16].mxu0  ;;  %v3264_v31 = vpop.f32.mrb[16].mxu1 }
 0x99a   :  { %v3908_v3 = vadd.f32 %v3223_v37, %v4722_v54  ;;  %v3225_v4 = vpop.f32.mrb[17].mxu0  ;;  %v3266_v44 = vpop.f32.mrb[17].mxu1  ;;  %v3910_v16 = vadd.f32 %v3264_v31, %v4744_v20  ;;  %v5268_v20 = vsub.s32 0, %v5267_v41 }
 0x99b   :  { %v3909_v40 = vadd.f32 %v3225_v4, %v4728_v0  ;;  %v3227_v5 = vpop.f32.mrb[18].mxu0  ;;  %v3268_v6 = vpop.f32.mrb[18].mxu1  ;;  %v3911_v57 = vadd.f32 %v3266_v44, %v4746_v22 }
 0x99c   :  { %v3889_v7 = vmul.f32 -1.442695, %v3908_v3  ;;  %v3228_v51 = vpop.f32.mrb[19].mxu0  ;;  %v3269_v50 = vpop.f32.mrb[19].mxu1  ;;  %v3335_v33 = vrot.slane %v3330_v9, %v5268_v20 }
 0x99d   :  { %v3890_v25 = vmul.f32 -1.442695, %v3909_v40  ;;  %v3891_v18 = vmul.f32 -1.442695, %v3911_v57 }
 0x99e   :  { %4281 = vpow2.f32 %v3889_v7 }
 0x99f   :  { %4283 = vpow2.f32 %v3890_v25 }
 0x9a0   :  { %4285 = vpow2.f32 %v3891_v18 }
 0x9a1   :  { %4287 = vtanh.f32 %v3910_v16 }
 0x9a8   :  { %v4282_v24 = vpop.eup %4281 }
 0x9a9   :  { %v4284_v12 = vpop.eup %4283  ;;  %v3278_v54 = vadd.f32 1.0, %v4282_v24 }
 0x9aa   :  { %v3284_v53 = vadd.f32 1.0, %v4284_v12  ;;  %v4286_v0 = vpop.eup %4285 }
 0x9ab   :  { %4289 = vrcp.f32 %v3278_v54  ;;  %v4288_v10 = vpop.eup %4287  ;;  %v3291_v49 = vadd.f32 1.0, %v4286_v0 }
 0x9ac   :  { %4291 = vrcp.f32 %v3284_v53 }
 0x9ad   :  { %4293 = vrcp.f32 %v3291_v49 }
 0x9b5   :  { %v4290_v19 = vpop.eup %4289 }
 0x9b6   :  { %v4292_v26 = vpop.eup %4291  ;;  %v3295_v22 = vmul.f32 %v4290_v19, %v4288_v10 }
 0x9b7   :  { %v3294_v13 = vmul.f32 %v4292_v26, %v5174_v11  ;;  %v4294_v32 = vpop.eup %4293 }
 0x9b9   :  { %v3456_v36 = vpop.f32.mrb[48].mxu0  ;;  %v3296_v23 = vadd.f32 %v3295_v22, %v3294_v13 }
 0x9ba   :  { %v3457_v15 = vadd.f32 %v3456_v36, %v3335_v33  ;;  %v3458_v17 = vpop.f32.mrb[49].mxu0 }
 0x9bb   :  { %v3459_v55 = vadd.f32 %v3458_v17, %v3339_v28  ;;  %v3460_v56 = vpop.f32.mrb[50].mxu0  ;;  %4295 = vtanh.f32 %v3296_v23 }
 0x9bc   :  { %3503 = vst [vmem:[#allocation12] sm:$0xff] %v3457_v15  ;;  %v3461_v14 = vadd.f32 %v3460_v56, %v3335_v33  ;;  %v3462_v58 = vpop.f32.mrb[51].mxu0 }
 0x9bd   :  { %3504 = vst [vmem:[#allocation12 + $0x8] sm:$0xff] %v3459_v55  ;;  %v3463_v8 = vadd.f32 %v3462_v58, %v3339_v28 }
 0x9be   :  { %3505 = vst [vmem:[#allocation12 + $0x10] sm:$0xff] %v3461_v14 }
 0x9bf   :  { %3506 = vst [vmem:[#allocation12 + $0x18] sm:$0xff] %v3463_v8 }
 0x9c1   :  { %v3466_v27 = vpop.f32.mrb[52].mxu0 }
 0x9c2   :  { %v3467_v11 = vadd.f32 %v3466_v27, %v3335_v33  ;;  %v3468_v34 = vpop.f32.mrb[53].mxu0 }
 0x9c3   :  { %v3469_v29 = vadd.f32 %v3468_v34, %v3339_v28  ;;  %v3470_v30 = vpop.f32.mrb[54].mxu0 }
 0x9c4   :  { %3507 = vst [vmem:[#allocation12 + $0x20] sm:$0xff] %v3467_v11  ;;  %v3471_v35 = vadd.f32 %v3470_v30, %v3335_v33  ;;  %v3472_v38 = vpop.f32.mrb[55].mxu0 }
 0x9c5   :  { %v4296_v52 = vpop.eup %4295  ;;  %3508 = vst [vmem:[#allocation12 + $0x28] sm:$0xff] %v3469_v29  ;;  %v3473_v39 = vadd.f32 %v3472_v38, %v3339_v28 }
 0x9c6   :  { %3509 = vst [vmem:[#allocation12 + $0x30] sm:$0xff] %v3471_v35  ;;  %v3298_v42 = vmul.f32 %v4296_v52, %v4294_v32 }
 0x9c7   :  { %3510 = vst [vmem:[#allocation12 + $0x38] sm:$0xff] %v3473_v39 }
 0x9c8   :  { %v3313_v43 = vpack.c.bf16 %v3298_v42, %v3298_v42 }
 0x9c9   :  { %v3476_v45 = vpop.f32.mrb[56].mxu0 }
 0x9ca   :  { %v3477_v46 = vadd.f32 %v3476_v45, %v3335_v33  ;;  %v3478_v47 = vpop.f32.mrb[57].mxu0  ;;  %3495 = vmatmul.mubr.bf16.gmra.mrb[64].mxu0 %v3313_v43 }
 0x9cb   :  { %v3479_v48 = vadd.f32 %v3478_v47, %v3339_v28  ;;  %v3480_v59 = vpop.f32.mrb[58].mxu0 }
 0x9cc   :  { %3511 = vst [vmem:[#allocation12 + $0x40] sm:$0xff] %v3477_v46  ;;  %v3481_v60 = vadd.f32 %v3480_v59, %v3335_v33  ;;  %v3482_v61 = vpop.f32.mrb[59].mxu0 }
 0x9cd   :  { %3512 = vst [vmem:[#allocation12 + $0x48] sm:$0xff] %v3479_v48  ;;  %v3483_v62 = vadd.f32 %v3482_v61, %v3339_v28 }
 0x9ce   :  { %3513 = vst [vmem:[#allocation12 + $0x50] sm:$0xff] %v3481_v60 }
 0x9cf   :  { %3514 = vst [vmem:[#allocation12 + $0x58] sm:$0xff] %v3483_v62 }
 0x9d1   :  { %v3486_v63 = vpop.f32.mrb[60].mxu0 }
 0x9d2   :  { %v3487_v1 = vadd.f32 %v3486_v63, %v3335_v33  ;;  %v3488_v2 = vpop.f32.mrb[61].mxu0 }
 0x9d3   :  { %v3489_v37 = vadd.f32 %v3488_v2, %v3339_v28  ;;  %v3490_v31 = vpop.f32.mrb[62].mxu0 }
 0x9d4   :  { %3515 = vst [vmem:[#allocation12 + $0x60] sm:$0xff] %v3487_v1  ;;  %v3491_v3 = vadd.f32 %v3490_v31, %v3335_v33  ;;  %v3492_v4 = vpop.f32.mrb[63].mxu0 }
 0x9d5   :  { %3516 = vst [vmem:[#allocation12 + $0x68] sm:$0xff] %v3489_v37  ;;  %v3493_v44 = vadd.f32 %v3492_v4, %v3339_v28 }
 0x9d6   :  { %3517 = vst [vmem:[#allocation12 + $0x70] sm:$0xff] %v3491_v3 }
 0x9d7   :  { %3518 = vst [vmem:[#allocation12 + $0x78] sm:$0xff] %v3493_v44 }
 0xa9d   :  { %v3496_v40 = vpop.f32.mrb[64].mxu0 }
 0xa9e   :  { %v3497_v5 = vadd.f32 %v3496_v40, %v3335_v33  ;;  %v3498_v6 = vpop.f32.mrb[65].mxu0 }
 0xa9f   :  { %v3499_v7 = vadd.f32 %v3498_v6, %v3339_v28  ;;  %v3500_v51 = vpop.f32.mrb[66].mxu0 }
 0xaa0   :  { %3519 = vst [vmem:[#allocation12 + $0x80] sm:$0xff] %v3497_v5  ;;  %v3501_v50 = vpop.f32.mrb[67].mxu0 }
 0xaa1   :  { %3520 = vst [vmem:[#allocation12 + $0x88] sm:$0xff] %v3499_v7 }
 0xaa2   :  { %4396 = shalt.err (!%p4393_p8)
}
 0xaa3   :  { %s4397_s9 = scalar_lea.hbm %s5222_s6, 2304 }
 0xaa4   :  { %p4398_p9 = scmp.ne.s32.totalorder %s5222_s6, %s4397_s9  ;;  %p4401_p10 = scmp.lt.u32.totalorder %s4397_s9, %s5222_s6 }
 0xaa6   :  { %p4403_p11 = pnand %p4401_p10, %p4398_p9 }
 0xaa8   :  { %4406 = shalt.err (!%p4403_p11)
}
 0xaa9   :  { %3532 = dma.vmem_to_hbm [thread:$0]  %s3527_s27, 2304, %s5222_s6, [#allocation6], %s4416_s7, %s4416_s7, %s4417_s8  }
 0xaaa   :  { %4413 = dma.done.wait [#allocation6], 2304  }
 0xaab   :  { %4414 = vsyncadd [#allocation6], 4294964992 }
 0xaac   :  { %3536 = vsyncpa [#allocation5], 1 }
 0xaad   :  { %3537 = vsyncpa [#allocation8], 1 }
 0xaae   :  { %3538 = vsyncpa [#allocation11], 1 }
 0xaaf   :  { %3539 = vsyncpa [#allocation6], 1 }

</bundles_post_ra>
